<compile_context>
chip_gen: v5e
topology: v5e:2x2
jax: 0.10.0
libtpu: 0.0.40
codegen_flags: <defaults>
</compile_context>

<pallas_src>
import math
import functools

import jax
import jax.numpy as jnp
from jax.experimental import pallas as pl
from jax.experimental.pallas import tpu as pltpu

# ---------------- small deterministic config (mirrors the module's __init__) ----------------
S, B = 8, 2                       # sequence length, batch
D_EMB = 32                        # config.hnet.d_emb
D_MODEL = 32                      # config.hnet.d_hnet
N_HEADS = 4                       # config.hnet.hypernet_heads
HEAD_DIM = D_MODEL // N_HEADS
N_TRANSFORMER_LAYERS = 2          # config.hnet.n_transformer_layers
N_LAYERS = 2                      # config.hnet.n_layers
NUM_HIDDEN_LAYERS = 2             # config.num_hidden_layers
D_A_SMALL = 4                     # config.hnet.d_a == config.hnet.a
D_A_BIG = 8                       # config.hnet.d_A == config.hnet.A
ADAPTORS_PER_LAYER = 2            # config.model.adaptors_per_layer
TARGET_MODULES = ("q_proj", "v_proj")
A_B = 2
D_OUTPUT = NUM_HIDDEN_LAYERS * (D_A_SMALL * D_A_BIG) * A_B * ADAPTORS_PER_LAYER  # = 256

N_TOK = S * B                     # 16 tokens
LANES = 128                       # slab lane width

VMEM_SPEC = pl.BlockSpec(memory_space=pltpu.MemorySpace.VMEM)


# ---------------------------------- fused kernel --------------------------------------------
def _layernorm(x, w, b, eps=1e-5):
    mu = jnp.mean(x, axis=-1, keepdims=True)
    var = jnp.mean((x - mu) ** 2, axis=-1, keepdims=True)
    return (x - mu) * jax.lax.rsqrt(var + eps) * w + b


def _fused_forward_kernel(x_ref, slab_ref, out_ref, *, layout,
                          n_enc_layers, n_heads, head_dim, d_model, n_tok):
    """Whole HyperNetOneShot forward; 2 input DMAs (x + packed param slab)."""
    def view(name):
        r0, rows, cols = layout[name]          # compile-time constants
        return slab_ref[r0:r0 + rows, 0:cols]  # static slice -> plain VMEM load

    H, N, E, dh = n_heads, n_tok, d_model, head_dim
    HN = H * N
    W = 2 * dh + E                             # fused [q | k | v@Wo] width = 48

    x = x_ref[...]                             # (N, d_emb)

    # ---------------- downsize_mlp: Linear -> ReLU -> Linear ----------------
    h = jnp.dot(x, view("ds_w1T"), preferred_element_type=jnp.float32) + view("ds_b1")
    h = jnp.maximum(h, 0.0)
    x = jnp.dot(h, view("ds_w2T"), preferred_element_type=jnp.float32) + view("ds_b2")

    attn_bias = view("attn_bias")              # (HN, HN): 0 same-head&batch, -1e30 otherwise

    # ---------------- transformer encoder (post-norm layers, eval mode) ----------------
    for li in range(n_enc_layers):
        p = f"enc{li}_"

        # One head-batched fused projection: per head [Q*scale | K | V@Wo_head].
        wqkv = view(p + "wqkvT").reshape(H, E, W)                     # (H, E, 48)
        xb = jnp.broadcast_to(x[None], (H, N, E))                     # (H, N, E)
        acts = jax.lax.dot_general(xb, wqkv, (((2,), (1,)), ((0,), (0,))),
                                   preferred_element_type=jnp.float32)  # (H, N, 48)
        acts = acts.reshape(HN, W) + view(p + "bqkv")                 # free leading merge

        q = acts[:, 0:dh]                                             # (HN, dh), scale folded
        k = acts[:, dh:2 * dh]                                        # (HN, dh)
        vo = acts[:, 2 * dh:2 * dh + E]                               # (HN, E) = V @ Wo_head

        # Head-folded attention: one (64,8)x(8,64) and one (64,64)x(64,32) matmul.
        s = jax.lax.dot_general(q, k, (((1,), (1,)), ((), ())),
                                preferred_element_type=jnp.float32) + attn_bias
        s = s - jnp.max(s, axis=-1, keepdims=True)
        pexp = jnp.exp(s)
        pattn = pexp * pl.reciprocal(jnp.sum(pexp, axis=-1, keepdims=True), approx=True)
        ctx = jnp.dot(pattn, vo, preferred_element_type=jnp.float32)  # (HN, E)

        # Heads already out-projected (V@Wo fold); combine = sum over head row-blocks.
        sa = jnp.sum(ctx.reshape(H, N, E), axis=0) + view(p + "bo")   # (N, E)

        h1 = _layernorm(x + sa, view(p + "ln1w"), view(p + "ln1b"))

        ff = jnp.dot(h1, view(p + "fw1T"), preferred_element_type=jnp.float32) + view(p + "fb1")
        ff = jnp.maximum(ff, 0.0)
        ff = jnp.dot(ff, view(p + "fw2T"), preferred_element_type=jnp.float32) + view(p + "fb2")
        x = _layernorm(h1 + ff, view(p + "ln2w"), view(p + "ln2b"))

    # ------------- mlp_encoder: Linear -> ReLU -> Linear (lane-dense 256-wide out) -------------
    h = jnp.dot(x, view("mlp_w1T"), preferred_element_type=jnp.float32) + view("mlp_b1")
    h = jnp.maximum(h, 0.0)
    b2 = view("mlp_b2")                                               # (2, 128)
    out_ref[:, 0:LANES] = (jnp.dot(h, view("mlp_w2Ta"),
                                   preferred_element_type=jnp.float32) + b2[0:1, :])
    out_ref[:, LANES:2 * LANES] = (jnp.dot(h, view("mlp_w2Tb"),
                                           preferred_element_type=jnp.float32) + b2[1:2, :])


# ------------------------------ parameter slab packing --------------------------------------
class _SlabPacker:
    """Packs 2-D f32 arrays (cols <= 128) into one (rows, 128) slab, 8-row aligned."""

    def __init__(self):
        self._chunks, self._layout, self._rows = [], {}, 0

    def add(self, name, arr):
        arr = jnp.asarray(arr, jnp.float32)
        if arr.ndim == 1:
            arr = arr.reshape(1, -1)
        rows, cols = arr.shape
        assert cols <= LANES, (name, arr.shape)
        pad_rows = -(-rows // 8) * 8
        chunk = jnp.zeros((pad_rows, LANES), jnp.float32).at[:rows, :cols].set(arr)
        self._chunks.append(chunk)
        self._layout[name] = (self._rows, rows, cols)
        self._rows += pad_rows

    def finish(self):
        return jnp.concatenate(self._chunks, axis=0), self._layout


def prepare_params(raw):
    """One-time prep: transpose / split per head / fold scale and V@Wo / pack one slab."""
    scale = 1.0 / math.sqrt(HEAD_DIM)
    E, dh, H, N = D_MODEL, HEAD_DIM, N_HEADS, N_TOK
    pk = _SlabPacker()

    # Precomputed attention bias for head-folded rows (row = head*N + (s*B + b)):
    # attend iff same head AND same batch element.
    row = jnp.arange(H * N)
    head_of = row // N
    batch_of = (row % N) % B
    same = (head_of[:, None] == head_of[None, :]) & (batch_of[:, None] == batch_of[None, :])
    pk.add("attn_bias", jnp.where(same, 0.0, -1e30).astype(jnp.float32))

    w1, b1, w2, b2 = raw["downsize"]
    pk.add("ds_w1T", w1.T); pk.add("ds_b1", b1)
    pk.add("ds_w2T", w2.T); pk.add("ds_b2", b2)

    for li, layer in enumerate(raw["encoder_layers"]):
        p = f"enc{li}_"
        wqkv, bqkv = layer["in_proj_w"], layer["in_proj_b"]          # (3E, E), (3E,)
        woT = layer["out_proj_w"].T                                  # (E, E)
        w_heads, b_heads = [], []
        for hh in range(H):
            sl = slice(hh * dh, (hh + 1) * dh)
            wq = wqkv[0 * E:1 * E][sl].T * scale                     # (E, dh), 1/sqrt(dh) folded
            wk = wqkv[1 * E:2 * E][sl].T                             # (E, dh)
            wv = wqkv[2 * E:3 * E][sl].T                             # (E, dh)
            bq = bqkv[0 * E:1 * E][sl] * scale
            bk = bqkv[1 * E:2 * E][sl]
            bv = bqkv[2 * E:3 * E][sl]
            woT_h = woT[sl, :]                                       # (dh, E) rows of out_proj^T
            wvo = wv @ woT_h                                         # (E, E)  V folded through Wo
            bvo = bv @ woT_h                                         # (E,)
            w_heads.append(jnp.concatenate([wq, wk, wvo], axis=1))   # (E, 48)
            b_heads.append(jnp.concatenate([bq, bk, bvo]))           # (48,)
        pk.add(p + "wqkvT", jnp.concatenate(w_heads, axis=0))        # (H*E, 48)
        pk.add(p + "bqkv", jnp.concatenate(                           # (H*N, 48) pre-broadcast
            [jnp.tile(b[None, :], (N, 1)) for b in b_heads], axis=0))
        pk.add(p + "bo", layer["out_proj_b"])
        pk.add(p + "fw1T", layer["lin1_w"].T); pk.add(p + "fb1", layer["lin1_b"])
        pk.add(p + "fw2T", layer["lin2_w"].T); pk.add(p + "fb2", layer["lin2_b"])
        pk.add(p + "ln1w", layer["ln1_w"]); pk.add(p + "ln1b", layer["ln1_b"])
        pk.add(p + "ln2w", layer["ln2_w"]); pk.add(p + "ln2b", layer["ln2_b"])

    w1, b1, w2, b2 = raw["mlp_encoder"]                              # (64,32),(64,),(256,64),(256,)
    pk.add("mlp_w1T", w1.T); pk.add("mlp_b1", b1)
    w2T = w2.T                                                       # (64, 256) -> two 128-lane halves
    pk.add("mlp_w2Ta", w2T[:, :LANES])
    pk.add("mlp_w2Tb", w2T[:, LANES:])
    pk.add("mlp_b2", b2.reshape(2, LANES))
    return pk.finish()


# ---------------------------------- wrapper -------------------------------------------------
def make_forward(layout):
    kernel = functools.partial(
        _fused_forward_kernel, layout=layout,
        n_enc_layers=N_TRANSFORMER_LAYERS, n_heads=N_HEADS,
        head_dim=HEAD_DIM, d_model=D_MODEL, n_tok=N_TOK)

    @jax.jit
    def forward(slab, task_embedding):
        s, b, d_emb = task_embedding.shape
        assert s * b == N_TOK
        x = task_embedding.reshape(s * b, d_emb)       # row order = seq*B + batch
        out = pl.pallas_call(
            kernel,
            out_shape=jax.ShapeDtypeStruct((s * b, D_OUTPUT), jnp.float32),
            in_specs=[VMEM_SPEC, VMEM_SPEC],
            out_specs=VMEM_SPEC,
        )(x, slab)
        # params.view(-1, n_layers * len(target_modules), A, a * 2)
        return out.reshape(-1, N_LAYERS * len(TARGET_MODULES), D_A_BIG, D_A_SMALL * 2)

    return forward


# ------------------------------ deterministic parameter init --------------------------------
def _xavier_normal(key, shape):                        # shape = (out, in), like torch Linear
    fan_out, fan_in = shape
    std = math.sqrt(2.0 / (fan_in + fan_out))
    return std * jax.random.normal(key, shape, dtype=jnp.float32)


def init_raw_params(key):
    """PyTorch-layout parameters (Linear weights are (out, in))."""
    keys = iter(jax.random.split(key, 64))
    params = {}
    params["downsize"] = (
        _xavier_normal(next(keys), (D_EMB, D_EMB)), jnp.zeros((D_EMB,), jnp.float32),
        _xavier_normal(next(keys), (D_MODEL, D_EMB)), jnp.zeros((D_MODEL,), jnp.float32),
    )
    layers = []
    for _ in range(N_TRANSFORMER_LAYERS):
        layers.append(dict(
            in_proj_w=_xavier_normal(next(keys), (3 * D_MODEL, D_MODEL)),
            in_proj_b=jnp.zeros((3 * D_MODEL,), jnp.float32),
            out_proj_w=_xavier_normal(next(keys), (D_MODEL, D_MODEL)),
            out_proj_b=jnp.zeros((D_MODEL,), jnp.float32),
            lin1_w=_xavier_normal(next(keys), (4 * D_MODEL, D_MODEL)),
            lin1_b=jnp.zeros((4 * D_MODEL,), jnp.float32),
            lin2_w=_xavier_normal(next(keys), (D_MODEL, 4 * D_MODEL)),
            lin2_b=jnp.zeros((D_MODEL,), jnp.float32),
            ln1_w=jnp.ones((D_MODEL,), jnp.float32),
            ln1_b=jnp.zeros((D_MODEL,), jnp.float32),
            ln2_w=jnp.ones((D_MODEL,), jnp.float32),
            ln2_b=jnp.zeros((D_MODEL,), jnp.float32),
        ))
    params["encoder_layers"] = layers
    params["mlp_encoder"] = (
        _xavier_normal(next(keys), (2 * D_MODEL, D_MODEL)), jnp.zeros((2 * D_MODEL,), jnp.float32),
        _xavier_normal(next(keys), (D_OUTPUT, 2 * D_MODEL)), jnp.zeros((D_OUTPUT,), jnp.float32),
    )
    return params


# ------------------------------ pure-JAX reference (validation) ------------------------------
def _reference_forward(raw, task_embedding):
    E, dh, H = D_MODEL, HEAD_DIM, N_HEADS
    x = task_embedding.reshape(-1, D_EMB)
    n = x.shape[0]
    w1, b1, w2, b2 = raw["downsize"]
    x = jnp.maximum(x @ w1.T + b1, 0.0) @ w2.T + b2
    bidx = jnp.arange(n) % B
    same_batch = bidx[:, None] == bidx[None, :]
    for layer in raw["encoder_layers"]:
        wqkv, bqkv = layer["in_proj_w"], layer["in_proj_b"]
        q = x @ wqkv[:E].T + bqkv[:E]
        k = x @ wqkv[E:2 * E].T + bqkv[E:2 * E]
        v = x @ wqkv[2 * E:].T + bqkv[2 * E:]
        heads = []
        for hh in range(H):
            sl = slice(hh * dh, (hh + 1) * dh)
            s = (q[:, sl] @ k[:, sl].T) / math.sqrt(dh)
            s = jnp.where(same_batch, s, -jnp.inf)
            heads.append(jax.nn.softmax(s, axis=-1) @ v[:, sl])
        sa = jnp.concatenate(heads, axis=1) @ layer["out_proj_w"].T + layer["out_proj_b"]
        h1 = _layernorm(x + sa, layer["ln1_w"], layer["ln1_b"])
        ff = jnp.maximum(h1 @ layer["lin1_w"].T + layer["lin1_b"], 0.0)
        ff = ff @ layer["lin2_w"].T + layer["lin2_b"]
        x = _layernorm(h1 + ff, layer["ln2_w"], layer["ln2_b"])
    w1, b1, w2, b2 = raw["mlp_encoder"]
    out = jnp.maximum(x @ w1.T + b1, 0.0) @ w2.T + b2
    return out.reshape(-1, N_LAYERS * len(TARGET_MODULES), D_A_BIG, D_A_SMALL * 2)


if __name__ == "__main__":
    key = jax.random.PRNGKey(0)
    k_param, k_input = jax.random.split(key)
    raw_params = init_raw_params(k_param)
    slab, layout = prepare_params(raw_params)          # one-time packing, hoisted out of forward
    task_embedding = jax.random.normal(k_input, (S, B, D_EMB), dtype=jnp.float32)

    fwd = make_forward(layout)
    out = jax.block_until_ready(fwd(slab, task_embedding))

    expected = (S * B, N_LAYERS * len(TARGET_MODULES), D_A_BIG, D_A_SMALL * 2)
    assert out.shape == expected, (out.shape, expected)
    assert bool(jnp.all(jnp.isfinite(out)))

    # Validate against an unfused pure-JAX reference (loose tol: approx softmax reciprocal).
    ref = _reference_forward(raw_params, task_embedding)
    max_diff = float(jnp.max(jnp.abs(out - ref)))
    assert max_diff < 5e-2, f"mismatch vs reference: max|diff|={max_diff}"

    print("KERNEL_OK")
</pallas_src>

<mosaic_0001>
module attributes {stable_mosaic.version = 11 : i64} {
  func.func @_fused_forward_kernel(%arg0: memref<16x32xf32, #tpu.memory_space<vmem>>, %arg1: memref<1136x128xf32, #tpu.memory_space<vmem>>, %arg2: memref<16x256xf32, #tpu.memory_space<vmem>>) attributes {dimension_semantics = [], scalar_prefetch = 0 : i64, scratch_operands = 0 : i64, tpu.core_type = #tpu.core_type<tc>} {
    %c0 = arith.constant 0 : index
    %c0_0 = arith.constant 0 : index
    %0 = vector.load %arg0[%c0, %c0_0] : memref<16x32xf32, #tpu.memory_space<vmem>>, vector<16x32xf32>
    %c64 = arith.constant 64 : index
    %c0_1 = arith.constant 0 : index
    %1 = vector.load %arg1[%c64, %c0_1] : memref<1136x128xf32, #tpu.memory_space<vmem>>, vector<32x32xf32>
    %cst = arith.constant dense<0.000000e+00> : vector<16x32xf32>
    %2 = tpu.matmul %0, %1, %cst {dimension_numbers = #tpu.dot_dimension_numbers<[1], [0], [0], [1], [0, 0, 1, 1], [], []>} : vector<16x32xf32>, vector<32x32xf32>, vector<16x32xf32> -> vector<16x32xf32>
    %c96 = arith.constant 96 : index
    %c0_2 = arith.constant 0 : index
    %3 = vector.load %arg1[%c96, %c0_2] : memref<1136x128xf32, #tpu.memory_space<vmem>>, vector<1x32xf32>
    %4 = vector.broadcast %3 : vector<1x32xf32> to vector<16x32xf32>
    %5 = arith.addf %2, %4 : vector<16x32xf32>
    %cst_3 = arith.constant 0.000000e+00 : f32
    %6 = vector.broadcast %cst_3 : f32 to vector<16x32xf32>
    %7 = arith.maximumf %5, %6 : vector<16x32xf32>
    %c104 = arith.constant 104 : index
    %c0_4 = arith.constant 0 : index
    %8 = vector.load %arg1[%c104, %c0_4] : memref<1136x128xf32, #tpu.memory_space<vmem>>, vector<32x32xf32>
    %cst_5 = arith.constant dense<0.000000e+00> : vector<16x32xf32>
    %9 = tpu.matmul %7, %8, %cst_5 {dimension_numbers = #tpu.dot_dimension_numbers<[1], [0], [0], [1], [0, 0, 1, 1], [], []>} : vector<16x32xf32>, vector<32x32xf32>, vector<16x32xf32> -> vector<16x32xf32>
    %c136 = arith.constant 136 : index
    %c0_6 = arith.constant 0 : index
    %10 = vector.load %arg1[%c136, %c0_6] : memref<1136x128xf32, #tpu.memory_space<vmem>>, vector<1x32xf32>
    %11 = vector.broadcast %10 : vector<1x32xf32> to vector<16x32xf32>
    %12 = arith.addf %9, %11 : vector<16x32xf32>
    %c0_7 = arith.constant 0 : index
    %c0_8 = arith.constant 0 : index
    %13 = vector.load %arg1[%c0_7, %c0_8] : memref<1136x128xf32, #tpu.memory_space<vmem>>, vector<64x64xf32>
    %c144 = arith.constant 144 : index
    %c0_9 = arith.constant 0 : index
    %14 = vector.load %arg1[%c144, %c0_9] : memref<1136x128xf32, #tpu.memory_space<vmem>>, vector<128x48xf32>
    %15 = vector.shape_cast %14 : vector<128x48xf32> to vector<4x32x48xf32>
    %16 = vector.shape_cast %12 : vector<16x32xf32> to vector<1x16x32xf32>
    %17 = vector.shape_cast %16 : vector<1x16x32xf32> to vector<1x16x32xf32>
    %18 = vector.broadcast %17 : vector<1x16x32xf32> to vector<4x16x32xf32>
    %cst_10 = arith.constant dense<0.000000e+00> : vector<4x16x48xf32>
    %19 = tpu.matmul %18, %15, %cst_10 {dimension_numbers = #tpu.dot_dimension_numbers<[2], [1], [1], [2], [0, 0, 0, 1, 1, 2], [0], [0]>} : vector<4x16x32xf32>, vector<4x32x48xf32>, vector<4x16x48xf32> -> vector<4x16x48xf32>
    %20 = vector.shape_cast %19 : vector<4x16x48xf32> to vector<64x48xf32>
    %c272 = arith.constant 272 : index
    %c0_11 = arith.constant 0 : index
    %21 = vector.load %arg1[%c272, %c0_11] : memref<1136x128xf32, #tpu.memory_space<vmem>>, vector<64x48xf32>
    %22 = arith.addf %20, %21 : vector<64x48xf32>
    %23 = vector.extract_strided_slice %22 {offsets = [0, 0], sizes = [64, 8], strides = [1, 1]} : vector<64x48xf32> to vector<64x8xf32>
    %24 = vector.extract_strided_slice %22 {offsets = [0, 8], sizes = [64, 8], strides = [1, 1]} : vector<64x48xf32> to vector<64x8xf32>
    %25 = vector.extract_strided_slice %22 {offsets = [0, 16], sizes = [64, 32], strides = [1, 1]} : vector<64x48xf32> to vector<64x32xf32>
    %cst_12 = arith.constant dense<0.000000e+00> : vector<64x64xf32>
    %26 = tpu.matmul %23, %24, %cst_12 {dimension_numbers = #tpu.dot_dimension_numbers<[1], [1], [0], [0], [0, 0, 1, 0], [], []>} : vector<64x8xf32>, vector<64x8xf32>, vector<64x64xf32> -> vector<64x64xf32>
    %27 = arith.addf %26, %13 : vector<64x64xf32>
    %cst_13 = arith.constant dense<0xFF800000> : vector<64xf32>
    %28 = vector.multi_reduction <maximumf>, %27, %cst_13 [1] : vector<64x64xf32> to vector<64xf32>
    %29 = vector.shape_cast %28 : vector<64xf32> to vector<64x1xf32>
    %30 = vector.broadcast %29 : vector<64x1xf32> to vector<64x64xf32>
    %31 = arith.subf %27, %30 : vector<64x64xf32>
    %32 = math.exp %31 : vector<64x64xf32>
    %cst_14 = arith.constant dense<0.000000e+00> : vector<64xf32>
    %33 = vector.multi_reduction <add>, %32, %cst_14 [1] : vector<64x64xf32> to vector<64xf32>
    %34 = vector.shape_cast %33 : vector<64xf32> to vector<64x1xf32>
    %35 = tpu.reciprocal %34 {approx = true} : vector<64x1xf32> -> vector<64x1xf32>
    %36 = vector.broadcast %35 : vector<64x1xf32> to vector<64x64xf32>
    %37 = arith.mulf %32, %36 : vector<64x64xf32>
    %cst_15 = arith.constant dense<0.000000e+00> : vector<64x32xf32>
    %38 = tpu.matmul %37, %25, %cst_15 {dimension_numbers = #tpu.dot_dimension_numbers<[1], [0], [0], [1], [0, 0, 1, 1], [], []>} : vector<64x64xf32>, vector<64x32xf32>, vector<64x32xf32> -> vector<64x32xf32>
    %39 = vector.shape_cast %38 : vector<64x32xf32> to vector<4x16x32xf32>
    %cst_16 = arith.constant dense<0.000000e+00> : vector<16x32xf32>
    %40 = vector.multi_reduction <add>, %39, %cst_16 [0] : vector<4x16x32xf32> to vector<16x32xf32>
    %c336 = arith.constant 336 : index
    %c0_17 = arith.constant 0 : index
    %41 = vector.load %arg1[%c336, %c0_17] : memref<1136x128xf32, #tpu.memory_space<vmem>>, vector<1x32xf32>
    %42 = vector.broadcast %41 : vector<1x32xf32> to vector<16x32xf32>
    %43 = arith.addf %40, %42 : vector<16x32xf32>
    %44 = arith.addf %12, %43 : vector<16x32xf32>
    %c520 = arith.constant 520 : index
    %c0_18 = arith.constant 0 : index
    %45 = vector.load %arg1[%c520, %c0_18] : memref<1136x128xf32, #tpu.memory_space<vmem>>, vector<1x32xf32>
    %c528 = arith.constant 528 : index
    %c0_19 = arith.constant 0 : index
    %46 = vector.load %arg1[%c528, %c0_19] : memref<1136x128xf32, #tpu.memory_space<vmem>>, vector<1x32xf32>
    %cst_20 = arith.constant dense<0.000000e+00> : vector<16xf32>
    %47 = vector.multi_reduction <add>, %44, %cst_20 [1] : vector<16x32xf32> to vector<16xf32>
    %48 = vector.shape_cast %47 : vector<16xf32> to vector<16x1xf32>
    %cst_21 = arith.constant 3.200000e+01 : f32
    %49 = vector.broadcast %cst_21 : f32 to vector<16x1xf32>
    %50 = arith.divf %48, %49 : vector<16x1xf32>
    %51 = vector.broadcast %50 : vector<16x1xf32> to vector<16x32xf32>
    %52 = arith.subf %44, %51 : vector<16x32xf32>
    %53 = arith.mulf %52, %52 : vector<16x32xf32>
    %cst_22 = arith.constant dense<0.000000e+00> : vector<16xf32>
    %54 = vector.multi_reduction <add>, %53, %cst_22 [1] : vector<16x32xf32> to vector<16xf32>
    %55 = vector.shape_cast %54 : vector<16xf32> to vector<16x1xf32>
    %cst_23 = arith.constant 3.200000e+01 : f32
    %56 = vector.broadcast %cst_23 : f32 to vector<16x1xf32>
    %57 = arith.divf %55, %56 : vector<16x1xf32>
    %58 = vector.broadcast %50 : vector<16x1xf32> to vector<16x32xf32>
    %59 = arith.subf %44, %58 : vector<16x32xf32>
    %cst_24 = arith.constant 9.99999974E-6 : f32
    %60 = vector.broadcast %cst_24 : f32 to vector<16x1xf32>
    %61 = arith.addf %57, %60 : vector<16x1xf32>
    %62 = math.rsqrt %61 : vector<16x1xf32>
    %63 = vector.broadcast %62 : vector<16x1xf32> to vector<16x32xf32>
    %64 = arith.mulf %59, %63 : vector<16x32xf32>
    %65 = vector.broadcast %45 : vector<1x32xf32> to vector<16x32xf32>
    %66 = arith.mulf %64, %65 : vector<16x32xf32>
    %67 = vector.broadcast %46 : vector<1x32xf32> to vector<16x32xf32>
    %68 = arith.addf %66, %67 : vector<16x32xf32>
    %c344 = arith.constant 344 : index
    %c0_25 = arith.constant 0 : index
    %69 = vector.load %arg1[%c344, %c0_25] : memref<1136x128xf32, #tpu.memory_space<vmem>>, vector<32x128xf32>
    %cst_26 = arith.constant dense<0.000000e+00> : vector<16x128xf32>
    %70 = tpu.matmul %68, %69, %cst_26 {dimension_numbers = #tpu.dot_dimension_numbers<[1], [0], [0], [1], [0, 0, 1, 1], [], []>} : vector<16x32xf32>, vector<32x128xf32>, vector<16x128xf32> -> vector<16x128xf32>
    %c376 = arith.constant 376 : index
    %c0_27 = arith.constant 0 : index
    %71 = vector.load %arg1[%c376, %c0_27] : memref<1136x128xf32, #tpu.memory_space<vmem>>, vector<1x128xf32>
    %72 = vector.broadcast %71 : vector<1x128xf32> to vector<16x128xf32>
    %73 = arith.addf %70, %72 : vector<16x128xf32>
    %cst_28 = arith.constant 0.000000e+00 : f32
    %74 = vector.broadcast %cst_28 : f32 to vector<16x128xf32>
    %75 = arith.maximumf %73, %74 : vector<16x128xf32>
    %c384 = arith.constant 384 : index
    %c0_29 = arith.constant 0 : index
    %76 = vector.load %arg1[%c384, %c0_29] : memref<1136x128xf32, #tpu.memory_space<vmem>>, vector<128x32xf32>
    %cst_30 = arith.constant dense<0.000000e+00> : vector<16x32xf32>
    %77 = tpu.matmul %75, %76, %cst_30 {dimension_numbers = #tpu.dot_dimension_numbers<[1], [0], [0], [1], [0, 0, 1, 1], [], []>} : vector<16x128xf32>, vector<128x32xf32>, vector<16x32xf32> -> vector<16x32xf32>
    %c512 = arith.constant 512 : index
    %c0_31 = arith.constant 0 : index
    %78 = vector.load %arg1[%c512, %c0_31] : memref<1136x128xf32, #tpu.memory_space<vmem>>, vector<1x32xf32>
    %79 = vector.broadcast %78 : vector<1x32xf32> to vector<16x32xf32>
    %80 = arith.addf %77, %79 : vector<16x32xf32>
    %81 = arith.addf %68, %80 : vector<16x32xf32>
    %c536 = arith.constant 536 : index
    %c0_32 = arith.constant 0 : index
    %82 = vector.load %arg1[%c536, %c0_32] : memref<1136x128xf32, #tpu.memory_space<vmem>>, vector<1x32xf32>
    %c544 = arith.constant 544 : index
    %c0_33 = arith.constant 0 : index
    %83 = vector.load %arg1[%c544, %c0_33] : memref<1136x128xf32, #tpu.memory_space<vmem>>, vector<1x32xf32>
    %cst_34 = arith.constant dense<0.000000e+00> : vector<16xf32>
    %84 = vector.multi_reduction <add>, %81, %cst_34 [1] : vector<16x32xf32> to vector<16xf32>
    %85 = vector.shape_cast %84 : vector<16xf32> to vector<16x1xf32>
    %cst_35 = arith.constant 3.200000e+01 : f32
    %86 = vector.broadcast %cst_35 : f32 to vector<16x1xf32>
    %87 = arith.divf %85, %86 : vector<16x1xf32>
    %88 = vector.broadcast %87 : vector<16x1xf32> to vector<16x32xf32>
    %89 = arith.subf %81, %88 : vector<16x32xf32>
    %90 = arith.mulf %89, %89 : vector<16x32xf32>
    %cst_36 = arith.constant dense<0.000000e+00> : vector<16xf32>
    %91 = vector.multi_reduction <add>, %90, %cst_36 [1] : vector<16x32xf32> to vector<16xf32>
    %92 = vector.shape_cast %91 : vector<16xf32> to vector<16x1xf32>
    %cst_37 = arith.constant 3.200000e+01 : f32
    %93 = vector.broadcast %cst_37 : f32 to vector<16x1xf32>
    %94 = arith.divf %92, %93 : vector<16x1xf32>
    %95 = vector.broadcast %87 : vector<16x1xf32> to vector<16x32xf32>
    %96 = arith.subf %81, %95 : vector<16x32xf32>
    %cst_38 = arith.constant 9.99999974E-6 : f32
    %97 = vector.broadcast %cst_38 : f32 to vector<16x1xf32>
    %98 = arith.addf %94, %97 : vector<16x1xf32>
    %99 = math.rsqrt %98 : vector<16x1xf32>
    %100 = vector.broadcast %99 : vector<16x1xf32> to vector<16x32xf32>
    %101 = arith.mulf %96, %100 : vector<16x32xf32>
    %102 = vector.broadcast %82 : vector<1x32xf32> to vector<16x32xf32>
    %103 = arith.mulf %101, %102 : vector<16x32xf32>
    %104 = vector.broadcast %83 : vector<1x32xf32> to vector<16x32xf32>
    %105 = arith.addf %103, %104 : vector<16x32xf32>
    %c552 = arith.constant 552 : index
    %c0_39 = arith.constant 0 : index
    %106 = vector.load %arg1[%c552, %c0_39] : memref<1136x128xf32, #tpu.memory_space<vmem>>, vector<128x48xf32>
    %107 = vector.shape_cast %106 : vector<128x48xf32> to vector<4x32x48xf32>
    %108 = vector.shape_cast %105 : vector<16x32xf32> to vector<1x16x32xf32>
    %109 = vector.shape_cast %108 : vector<1x16x32xf32> to vector<1x16x32xf32>
    %110 = vector.broadcast %109 : vector<1x16x32xf32> to vector<4x16x32xf32>
    %cst_40 = arith.constant dense<0.000000e+00> : vector<4x16x48xf32>
    %111 = tpu.matmul %110, %107, %cst_40 {dimension_numbers = #tpu.dot_dimension_numbers<[2], [1], [1], [2], [0, 0, 0, 1, 1, 2], [0], [0]>} : vector<4x16x32xf32>, vector<4x32x48xf32>, vector<4x16x48xf32> -> vector<4x16x48xf32>
    %112 = vector.shape_cast %111 : vector<4x16x48xf32> to vector<64x48xf32>
    %c680 = arith.constant 680 : index
    %c0_41 = arith.constant 0 : index
    %113 = vector.load %arg1[%c680, %c0_41] : memref<1136x128xf32, #tpu.memory_space<vmem>>, vector<64x48xf32>
    %114 = arith.addf %112, %113 : vector<64x48xf32>
    %115 = vector.extract_strided_slice %114 {offsets = [0, 0], sizes = [64, 8], strides = [1, 1]} : vector<64x48xf32> to vector<64x8xf32>
    %116 = vector.extract_strided_slice %114 {offsets = [0, 8], sizes = [64, 8], strides = [1, 1]} : vector<64x48xf32> to vector<64x8xf32>
    %117 = vector.extract_strided_slice %114 {offsets = [0, 16], sizes = [64, 32], strides = [1, 1]} : vector<64x48xf32> to vector<64x32xf32>
    %cst_42 = arith.constant dense<0.000000e+00> : vector<64x64xf32>
    %118 = tpu.matmul %115, %116, %cst_42 {dimension_numbers = #tpu.dot_dimension_numbers<[1], [1], [0], [0], [0, 0, 1, 0], [], []>} : vector<64x8xf32>, vector<64x8xf32>, vector<64x64xf32> -> vector<64x64xf32>
    %119 = arith.addf %118, %13 : vector<64x64xf32>
    %cst_43 = arith.constant dense<0xFF800000> : vector<64xf32>
    %120 = vector.multi_reduction <maximumf>, %119, %cst_43 [1] : vector<64x64xf32> to vector<64xf32>
    %121 = vector.shape_cast %120 : vector<64xf32> to vector<64x1xf32>
    %122 = vector.broadcast %121 : vector<64x1xf32> to vector<64x64xf32>
    %123 = arith.subf %119, %122 : vector<64x64xf32>
    %124 = math.exp %123 : vector<64x64xf32>
    %cst_44 = arith.constant dense<0.000000e+00> : vector<64xf32>
    %125 = vector.multi_reduction <add>, %124, %cst_44 [1] : vector<64x64xf32> to vector<64xf32>
    %126 = vector.shape_cast %125 : vector<64xf32> to vector<64x1xf32>
    %127 = tpu.reciprocal %126 {approx = true} : vector<64x1xf32> -> vector<64x1xf32>
    %128 = vector.broadcast %127 : vector<64x1xf32> to vector<64x64xf32>
    %129 = arith.mulf %124, %128 : vector<64x64xf32>
    %cst_45 = arith.constant dense<0.000000e+00> : vector<64x32xf32>
    %130 = tpu.matmul %129, %117, %cst_45 {dimension_numbers = #tpu.dot_dimension_numbers<[1], [0], [0], [1], [0, 0, 1, 1], [], []>} : vector<64x64xf32>, vector<64x32xf32>, vector<64x32xf32> -> vector<64x32xf32>
    %131 = vector.shape_cast %130 : vector<64x32xf32> to vector<4x16x32xf32>
    %cst_46 = arith.constant dense<0.000000e+00> : vector<16x32xf32>
    %132 = vector.multi_reduction <add>, %131, %cst_46 [0] : vector<4x16x32xf32> to vector<16x32xf32>
    %c744 = arith.constant 744 : index
    %c0_47 = arith.constant 0 : index
    %133 = vector.load %arg1[%c744, %c0_47] : memref<1136x128xf32, #tpu.memory_space<vmem>>, vector<1x32xf32>
    %134 = vector.broadcast %133 : vector<1x32xf32> to vector<16x32xf32>
    %135 = arith.addf %132, %134 : vector<16x32xf32>
    %136 = arith.addf %105, %135 : vector<16x32xf32>
    %c928 = arith.constant 928 : index
    %c0_48 = arith.constant 0 : index
    %137 = vector.load %arg1[%c928, %c0_48] : memref<1136x128xf32, #tpu.memory_space<vmem>>, vector<1x32xf32>
    %c936 = arith.constant 936 : index
    %c0_49 = arith.constant 0 : index
    %138 = vector.load %arg1[%c936, %c0_49] : memref<1136x128xf32, #tpu.memory_space<vmem>>, vector<1x32xf32>
    %cst_50 = arith.constant dense<0.000000e+00> : vector<16xf32>
    %139 = vector.multi_reduction <add>, %136, %cst_50 [1] : vector<16x32xf32> to vector<16xf32>
    %140 = vector.shape_cast %139 : vector<16xf32> to vector<16x1xf32>
    %cst_51 = arith.constant 3.200000e+01 : f32
    %141 = vector.broadcast %cst_51 : f32 to vector<16x1xf32>
    %142 = arith.divf %140, %141 : vector<16x1xf32>
    %143 = vector.broadcast %142 : vector<16x1xf32> to vector<16x32xf32>
    %144 = arith.subf %136, %143 : vector<16x32xf32>
    %145 = arith.mulf %144, %144 : vector<16x32xf32>
    %cst_52 = arith.constant dense<0.000000e+00> : vector<16xf32>
    %146 = vector.multi_reduction <add>, %145, %cst_52 [1] : vector<16x32xf32> to vector<16xf32>
    %147 = vector.shape_cast %146 : vector<16xf32> to vector<16x1xf32>
    %cst_53 = arith.constant 3.200000e+01 : f32
    %148 = vector.broadcast %cst_53 : f32 to vector<16x1xf32>
    %149 = arith.divf %147, %148 : vector<16x1xf32>
    %150 = vector.broadcast %142 : vector<16x1xf32> to vector<16x32xf32>
    %151 = arith.subf %136, %150 : vector<16x32xf32>
    %cst_54 = arith.constant 9.99999974E-6 : f32
    %152 = vector.broadcast %cst_54 : f32 to vector<16x1xf32>
    %153 = arith.addf %149, %152 : vector<16x1xf32>
    %154 = math.rsqrt %153 : vector<16x1xf32>
    %155 = vector.broadcast %154 : vector<16x1xf32> to vector<16x32xf32>
    %156 = arith.mulf %151, %155 : vector<16x32xf32>
    %157 = vector.broadcast %137 : vector<1x32xf32> to vector<16x32xf32>
    %158 = arith.mulf %156, %157 : vector<16x32xf32>
    %159 = vector.broadcast %138 : vector<1x32xf32> to vector<16x32xf32>
    %160 = arith.addf %158, %159 : vector<16x32xf32>
    %c752 = arith.constant 752 : index
    %c0_55 = arith.constant 0 : index
    %161 = vector.load %arg1[%c752, %c0_55] : memref<1136x128xf32, #tpu.memory_space<vmem>>, vector<32x128xf32>
    %cst_56 = arith.constant dense<0.000000e+00> : vector<16x128xf32>
    %162 = tpu.matmul %160, %161, %cst_56 {dimension_numbers = #tpu.dot_dimension_numbers<[1], [0], [0], [1], [0, 0, 1, 1], [], []>} : vector<16x32xf32>, vector<32x128xf32>, vector<16x128xf32> -> vector<16x128xf32>
    %c784 = arith.constant 784 : index
    %c0_57 = arith.constant 0 : index
    %163 = vector.load %arg1[%c784, %c0_57] : memref<1136x128xf32, #tpu.memory_space<vmem>>, vector<1x128xf32>
    %164 = vector.broadcast %163 : vector<1x128xf32> to vector<16x128xf32>
    %165 = arith.addf %162, %164 : vector<16x128xf32>
    %cst_58 = arith.constant 0.000000e+00 : f32
    %166 = vector.broadcast %cst_58 : f32 to vector<16x128xf32>
    %167 = arith.maximumf %165, %166 : vector<16x128xf32>
    %c792 = arith.constant 792 : index
    %c0_59 = arith.constant 0 : index
    %168 = vector.load %arg1[%c792, %c0_59] : memref<1136x128xf32, #tpu.memory_space<vmem>>, vector<128x32xf32>
    %cst_60 = arith.constant dense<0.000000e+00> : vector<16x32xf32>
    %169 = tpu.matmul %167, %168, %cst_60 {dimension_numbers = #tpu.dot_dimension_numbers<[1], [0], [0], [1], [0, 0, 1, 1], [], []>} : vector<16x128xf32>, vector<128x32xf32>, vector<16x32xf32> -> vector<16x32xf32>
    %c920 = arith.constant 920 : index
    %c0_61 = arith.constant 0 : index
    %170 = vector.load %arg1[%c920, %c0_61] : memref<1136x128xf32, #tpu.memory_space<vmem>>, vector<1x32xf32>
    %171 = vector.broadcast %170 : vector<1x32xf32> to vector<16x32xf32>
    %172 = arith.addf %169, %171 : vector<16x32xf32>
    %173 = arith.addf %160, %172 : vector<16x32xf32>
    %c944 = arith.constant 944 : index
    %c0_62 = arith.constant 0 : index
    %174 = vector.load %arg1[%c944, %c0_62] : memref<1136x128xf32, #tpu.memory_space<vmem>>, vector<1x32xf32>
    %c952 = arith.constant 952 : index
    %c0_63 = arith.constant 0 : index
    %175 = vector.load %arg1[%c952, %c0_63] : memref<1136x128xf32, #tpu.memory_space<vmem>>, vector<1x32xf32>
    %cst_64 = arith.constant dense<0.000000e+00> : vector<16xf32>
    %176 = vector.multi_reduction <add>, %173, %cst_64 [1] : vector<16x32xf32> to vector<16xf32>
    %177 = vector.shape_cast %176 : vector<16xf32> to vector<16x1xf32>
    %cst_65 = arith.constant 3.200000e+01 : f32
    %178 = vector.broadcast %cst_65 : f32 to vector<16x1xf32>
    %179 = arith.divf %177, %178 : vector<16x1xf32>
    %180 = vector.broadcast %179 : vector<16x1xf32> to vector<16x32xf32>
    %181 = arith.subf %173, %180 : vector<16x32xf32>
    %182 = arith.mulf %181, %181 : vector<16x32xf32>
    %cst_66 = arith.constant dense<0.000000e+00> : vector<16xf32>
    %183 = vector.multi_reduction <add>, %182, %cst_66 [1] : vector<16x32xf32> to vector<16xf32>
    %184 = vector.shape_cast %183 : vector<16xf32> to vector<16x1xf32>
    %cst_67 = arith.constant 3.200000e+01 : f32
    %185 = vector.broadcast %cst_67 : f32 to vector<16x1xf32>
    %186 = arith.divf %184, %185 : vector<16x1xf32>
    %187 = vector.broadcast %179 : vector<16x1xf32> to vector<16x32xf32>
    %188 = arith.subf %173, %187 : vector<16x32xf32>
    %cst_68 = arith.constant 9.99999974E-6 : f32
    %189 = vector.broadcast %cst_68 : f32 to vector<16x1xf32>
    %190 = arith.addf %186, %189 : vector<16x1xf32>
    %191 = math.rsqrt %190 : vector<16x1xf32>
    %192 = vector.broadcast %191 : vector<16x1xf32> to vector<16x32xf32>
    %193 = arith.mulf %188, %192 : vector<16x32xf32>
    %194 = vector.broadcast %174 : vector<1x32xf32> to vector<16x32xf32>
    %195 = arith.mulf %193, %194 : vector<16x32xf32>
    %196 = vector.broadcast %175 : vector<1x32xf32> to vector<16x32xf32>
    %197 = arith.addf %195, %196 : vector<16x32xf32>
    %c960 = arith.constant 960 : index
    %c0_69 = arith.constant 0 : index
    %198 = vector.load %arg1[%c960, %c0_69] : memref<1136x128xf32, #tpu.memory_space<vmem>>, vector<32x64xf32>
    %cst_70 = arith.constant dense<0.000000e+00> : vector<16x64xf32>
    %199 = tpu.matmul %197, %198, %cst_70 {dimension_numbers = #tpu.dot_dimension_numbers<[1], [0], [0], [1], [0, 0, 1, 1], [], []>} : vector<16x32xf32>, vector<32x64xf32>, vector<16x64xf32> -> vector<16x64xf32>
    %c992 = arith.constant 992 : index
    %c0_71 = arith.constant 0 : index
    %200 = vector.load %arg1[%c992, %c0_71] : memref<1136x128xf32, #tpu.memory_space<vmem>>, vector<1x64xf32>
    %201 = vector.broadcast %200 : vector<1x64xf32> to vector<16x64xf32>
    %202 = arith.addf %199, %201 : vector<16x64xf32>
    %cst_72 = arith.constant 0.000000e+00 : f32
    %203 = vector.broadcast %cst_72 : f32 to vector<16x64xf32>
    %204 = arith.maximumf %202, %203 : vector<16x64xf32>
    %c1128 = arith.constant 1128 : index
    %c0_73 = arith.constant 0 : index
    %205 = vector.load %arg1[%c1128, %c0_73] : memref<1136x128xf32, #tpu.memory_space<vmem>>, vector<2x128xf32>
    %c1000 = arith.constant 1000 : index
    %c0_74 = arith.constant 0 : index
    %206 = vector.load %arg1[%c1000, %c0_74] : memref<1136x128xf32, #tpu.memory_space<vmem>>, vector<64x128xf32>
    %cst_75 = arith.constant dense<0.000000e+00> : vector<16x128xf32>
    %207 = tpu.matmul %204, %206, %cst_75 {dimension_numbers = #tpu.dot_dimension_numbers<[1], [0], [0], [1], [0, 0, 1, 1], [], []>} : vector<16x64xf32>, vector<64x128xf32>, vector<16x128xf32> -> vector<16x128xf32>
    %208 = vector.extract_strided_slice %205 {offsets = [0, 0], sizes = [1, 128], strides = [1, 1]} : vector<2x128xf32> to vector<1x128xf32>
    %209 = vector.broadcast %208 : vector<1x128xf32> to vector<16x128xf32>
    %210 = arith.addf %207, %209 : vector<16x128xf32>
    %c0_76 = arith.constant 0 : index
    %c0_77 = arith.constant 0 : index
    %211 = vector.load %arg2[%c0_76, %c0_77] : memref<16x256xf32, #tpu.memory_space<vmem>>, vector<16x128xf32>
    tpu.vector_store %arg2[%c0_76, %c0_77], %210 {strides = array<i32>} : memref<16x256xf32, #tpu.memory_space<vmem>>, vector<16x128xf32>,
    %c1064 = arith.constant 1064 : index
    %c0_78 = arith.constant 0 : index
    %212 = vector.load %arg1[%c1064, %c0_78] : memref<1136x128xf32, #tpu.memory_space<vmem>>, vector<64x128xf32>
    %cst_79 = arith.constant dense<0.000000e+00> : vector<16x128xf32>
    %213 = tpu.matmul %204, %212, %cst_79 {dimension_numbers = #tpu.dot_dimension_numbers<[1], [0], [0], [1], [0, 0, 1, 1], [], []>} : vector<16x64xf32>, vector<64x128xf32>, vector<16x128xf32> -> vector<16x128xf32>
    %214 = vector.extract_strided_slice %205 {offsets = [1, 0], sizes = [1, 128], strides = [1, 1]} : vector<2x128xf32> to vector<1x128xf32>
    %215 = vector.broadcast %214 : vector<1x128xf32> to vector<16x128xf32>
    %216 = arith.addf %213, %215 : vector<16x128xf32>
    %c0_80 = arith.constant 0 : index
    %c128 = arith.constant 128 : index
    %217 = vector.load %arg2[%c0_80, %c128] : memref<16x256xf32, #tpu.memory_space<vmem>>, vector<16x128xf32>
    tpu.vector_store %arg2[%c0_80, %c128], %216 {strides = array<i32>} : memref<16x256xf32, #tpu.memory_space<vmem>>, vector<16x128xf32>,
    return
  }
}

</mosaic_0001>

<bundles_post_ra>
// kernel: forward.1
= control target key start
LH: loop header
LB: loop body
LE: loop exit
PB: predicated region body
PF: predicated region fallthrough
CT: control target
= control target key end

     0   :  { %7 = vsyncpa [#allocation3], 0  ;;  %s2187_s0 = inlined_call_operand.hbm [shape: f32[16,32], index: 0, kind: input, shape index: {}]   ;;  %s2188_s1 = inlined_call_operand.hbm [shape: f32[1136,128], index: 1, kind: input, shape index: {}]   ;;  %s2189_s2 = inlined_call_operand.vmem [shape: f32[16,256], index: 2, kind: output, shape index: {}]  }
   0x1   :  { %s13_s11 = sshll.u32 %s2187_s0, 4  ;;  %s14_s11 = int_to_ptr.hbm [resolvable:$true] %s13_s11 }
   0x2   :  { %8 = vsyncpa [#allocation5], 0  ;;  %s1749_s12 = smov [#allocation2]   ;;  %s26_s16 = sshll.u32 %s2188_s1, 4  ;;  %s27_s16 = int_to_ptr.hbm [resolvable:$true] %s26_s16 }
   0x3   :  { %s15_s13 = sshll.u32 %s1749_s12, 4  ;;  %s1750_s17 = smov 128   ;;  %s16_s13 = int_to_ptr.vmem [resolvable:$true] %s15_s13 }
   0x4   :  { %s1751_s18 = smov 8   ;;  %s1752_s19 = smov [#allocation4]  }
   0x5   :  { %21 = dma.hbm_to_vmem [thread:$0]  %s14_s11, 256, %s16_s13, [#allocation3], %s1750_s17, %s1750_s17, %s1751_s18  }
   0x6   :  { %s28_s20 = sshll.u32 %s1752_s19, 4  ;;  %s29_s20 = int_to_ptr.vmem [resolvable:$true] %s28_s20 }
   0x7   :  { %34 = dma.hbm_to_vmem [thread:$0]  %s27_s16, 18176, %s29_s20, [#allocation5], %s1750_s17, %s1750_s17, %s1751_s18  }
   0x8   :  { %1745 = dma.done.wait [#allocation3], 256  }
   0x9   :  { %1746 = vsyncadd [#allocation3], 4294967040 }
   0xa   :  { %1747 = dma.done.wait [#allocation5], 18176  }
   0xb   :  { %1748 = vsyncadd [#allocation5], 4294949120  ;;  %v48_v0 = vld [vmem:[#allocation4 + $0x58] sm:$0xff]  ;;  %v47_v1 = vld [vmem:[#allocation4 + $0x50] sm:$0xff]  ;;  %vm51_vm0 = vcmask 261120   ;;  %s1753_s0 = smov 120  }
   0xc   :  { %70 = vmatpush.msra.mxu0 %v48_v0  ;;  %1547 = vmatpush.msra.mxu2 %v48_v0  ;;  %v46_v2 = vld [vmem:[#allocation4 + $0x48] sm:$0xff]  ;;  %v45_v3 = vld [vmem:[#allocation4 + $0x40] sm:$0xff]  ;;  %v43_v5 = vld [vmem:[#allocation2] sm:$0xff]  ;;  %vm280_vm1 = vcmask 64512   ;;  %vm354_vm2 = vcmask 523264   ;;  %s1754_s1 = smov 112  }
   0xd   :  { %v86_v4 = vld [vmem:[#allocation4 + $0x80] sm:$0xff]  ;;  %v44_v6 = vld [vmem:[#allocation2 + $0x8] sm:$0xff]  ;;  %v84_v8 = vld [vmem:[#allocation4 + $0x70] sm:$0xff] }
   0xe   :  { %71 = vmatpush.msra.mxu0 %v47_v1  ;;  %1548 = vmatpush.msra.mxu2 %v47_v1  ;;  %v85_v7 = vld [vmem:[#allocation4 + $0x78] sm:$0xff]  ;;  %v83_v9 = vld [vmem:[#allocation4 + $0x68] sm:$0xff]  ;;  %v128_v14 = vld [vmem:[#allocation4 + $0xa0] sm:$0xff] }
   0xf   :  { %107 = vmatpush.msra.mxu1 %v86_v4  ;;  %v129_v10 = vld [vmem:[#allocation4 + $0xa8] sm:$0xff]  ;;  %v132_v15 = vld [vmem:[#allocation4 + $0xc0] sm:$0xff]  ;;  %v127_v25 = vld [vmem:[#allocation4 + $0x98] sm:$0xff] }
  0x10   :  { %72 = vmatpush.msra.mxu0 %v46_v2  ;;  %1549 = vmatpush.msra.mxu2 %v46_v2  ;;  %v133_v11 = vld [vmem:[#allocation4 + $0xc8] sm:$0xff]  ;;  %v136_v16 = vld [vmem:[#allocation4 + $0xe0] sm:$0xff]  ;;  %v131_v26 = vld [vmem:[#allocation4 + $0xb8] sm:$0xff] }
  0x11   :  { %108 = vmatpush.msra.mxu1 %v85_v7  ;;  %v137_v12 = vld [vmem:[#allocation4 + $0xe8] sm:$0xff]  ;;  %183 = vmatpush.msra.mxu3 %v133_v11  ;;  %v140_v17 = vld [vmem:[#allocation4 + $0x100] sm:$0xff]  ;;  %v135_v27 = vld [vmem:[#allocation4 + $0xd8] sm:$0xff] }
  0x12   :  { %73 = vmatpush.msra.mxu0 %v45_v3  ;;  %1550 = vmatpush.msra.mxu2 %v45_v3  ;;  %v141_v13 = vld [vmem:[#allocation4 + $0x108] sm:$0xff]  ;;  %v1598_v18 = vld [vmem:[#allocation4 + $0x60] ss:$0 sm:$0xff]  ;;  %v139_v28 = vld [vmem:[#allocation4 + $0xf8] sm:$0xff] }
  0x13   :  { %1469 = vmatmul.msk.f32.vlgmr.msra.gmra.mxu0 %vm51_vm0, %v43_v5  ;;  %1470 = vmatmul.msk.f32.vlgmr.msra.gmra.mxu2 %vm51_vm0, %v44_v6  ;;  %v126_v29 = vld [vmem:[#allocation4 + $0x90] sm:$0xff]  ;;  %v1599_v33 = vld [vmem:[#allocation4 + $0x88] ss:$0 sm:$0xff]  ;;  %v245_v41 = vld [vmem:[#allocation4 + $0x138] sm:$0xff] }
  0x14   :  { %109 = vmatpush.msra.mxu1 %v84_v8  ;;  %160 = vmatpush.msrb.mxu2 %v129_v10  ;;  %v130_v30 = vld [vmem:[#allocation4 + $0xb0] sm:$0xff]  ;;  %v247_v42 = vld [vmem:[#allocation4 + $0x148] sm:$0xff]  ;;  %v246_v51 = vld [vmem:[#allocation4 + $0x140] sm:$0xff] }
  0x15   :  { %206 = vmatpush.msrb.mxu0 %v137_v12  ;;  %184 = vmatpush.msra.mxu3 %v132_v15  ;;  %v134_v31 = vld [vmem:[#allocation4 + $0xd0] sm:$0xff]  ;;  %v243_v47 = vld [vmem:[#allocation4 + $0x128] sm:$0xff]  ;;  %v242_v55 = vld [vmem:[#allocation4 + $0x120] sm:$0xff] }
  0x16   :  { %110 = vmatpush.msra.mxu1 %v83_v9  ;;  %161 = vmatpush.msrb.mxu2 %v128_v14  ;;  %v138_v32 = vld [vmem:[#allocation4 + $0xf0] sm:$0xff]  ;;  %v241_v59 = vld [vmem:[#allocation4 + $0x118] sm:$0xff]  ;;  %v1857_v6 = vld [vmem:[#allocation4] sm:$0xff] }
  0x17   :  { %207 = vmatpush.msrb.mxu0 %v136_v16  ;;  %185 = vmatpush.msra.mxu3 %v131_v26  ;;  %v244_v50 = vld [vmem:[#allocation4 + $0x130] sm:$0xff]  ;;  %v1861_v10 = vld [vmem:[#allocation4 + $0x8] sm:$0xff] }
  0x18   :  { %229 = vmatpush.msrb.mxu1 %v141_v13  ;;  %162 = vmatpush.msrb.mxu2 %v127_v25  ;;  %v240_v56 = vld [vmem:[#allocation4 + $0x110] sm:$0xff] }
  0x19   :  { %208 = vmatpush.msrb.mxu0 %v135_v27  ;;  %186 = vmatpush.msra.mxu3 %v130_v30  ;;  %v1865_v14 = vld [vmem:[#allocation4 + $0x10] sm:$0xff] }
  0x1a   :  { %230 = vmatpush.msrb.mxu1 %v140_v17  ;;  %163 = vmatpush.msrb.mxu2 %v126_v29  ;;  %v1886_v29 = vld [vmem:[#allocation4 + $0x30] sm:$0xff] }
  0x1b   :  { %209 = vmatpush.msrb.mxu0 %v134_v31 }
  0x1c   :  { %231 = vmatpush.msrb.mxu1 %v139_v28 }
  0x1e   :  { %232 = vmatpush.msrb.mxu1 %v138_v32 }
  0x90   :  { %v75_v19 = vpop.f32.mrf.mxu0 }
  0x91   :  { %v76_v20 = vadd.f32 %v1598_v18, %v75_v19 }
  0x93   :  { %v81_v21 = vmax.f32 %v76_v20, 0.0 }
  0x95   :  { %1471 = vmatmul.msk.f32.vlgmr.msra.gmra.mxu1 %vm51_vm0, %v81_v21 }
  0x96   :  { %v78_v22 = vpop.f32.mrf.mxu2 }
  0x97   :  { %v79_v23 = vadd.f32 %v1598_v18, %v78_v22  ;;  %v1872_v18 = vld [vmem:[#allocation4 + $0x18] sm:$0xff]  ;;  %v1876_v22 = vld [vmem:[#allocation4 + $0x20] sm:$0xff] }
  0x99   :  { %v82_v24 = vmax.f32 %v79_v23, 0.0 }
  0x9d   :  { %1472 = vmatmul.msk.f32.gmra.mxu1 %vm51_vm0, %v82_v24 }
 0x112   :  { %v112_v34 = vpop.f32.mrf.mxu1 }
 0x113   :  { %v1781_v35 = vadd.f32 %v1599_v33, %v112_v34 }
 0x115   :  { %1473 = vmatmul.msk.f32.vlgmr.msrb.gmra.mxu2 %vm51_vm0, %v1781_v35  ;;  %1475 = vmatmul.msk.f32.vlgmr.msra.gmra.mxu3 %vm51_vm0, %v1781_v35 }
 0x116   :  { %1477 = vmatmul.msk.f32.vlgmr.msrb.gmra.mxu0 %vm51_vm0, %v1781_v35  ;;  %1479 = vmatmul.msk.f32.vlgmr.msrb.gmra.mxu1 %vm51_vm0, %v1781_v35 }
 0x11a   :  { %v115_v36 = vpop.f32.mrf.mxu1 }
 0x11b   :  { %v1791_v37 = vadd.f32 %v1599_v33, %v115_v36  ;;  %v1890_v33 = vld [vmem:[#allocation4 + $0x28] sm:$0xff] }
 0x11d   :  { %1474 = vmatmul.msk.f32.gmra.mxu2 %vm51_vm0, %v1791_v37  ;;  %1476 = vmatmul.msk.f32.gmra.mxu3 %vm51_vm0, %v1791_v37 }
 0x11e   :  { %1478 = vmatmul.msk.f32.gmra.mxu0 %vm51_vm0, %v1791_v37  ;;  %1480 = vmatmul.msk.f32.gmra.mxu1 %vm51_vm0, %v1791_v37 }
 0x193   :  { %v211_v38 = vpop.f32.mrf.mxu0  ;;  %v234_v39 = vpop.f32.mrf.mxu1 }
 0x194   :  { %v1813_v53 = vadd.f32 %v244_v50, %v211_v38  ;;  %v1815_v54 = vadd.f32 %v246_v51, %v234_v39  ;;  %v1897_v38 = vld [vmem:[#allocation4 + $0x38] sm:$0xff] }
 0x198   :  { %v188_v40 = vpop.f32.mrf.mxu3  ;;  %v165_v48 = vpop.f32.mrf.mxu2 }
 0x199   :  { %v1821_v57 = vadd.f32 %v242_v55, %v188_v40  ;;  %v1825_v60 = vadd.f32 %v240_v56, %v165_v48 }
 0x19b   :  { %v214_v43 = vpop.f32.mrf.mxu0  ;;  %v237_v44 = vpop.f32.mrf.mxu1 }
 0x19c   :  { %v1801_v45 = vadd.f32 %v245_v41, %v214_v43  ;;  %v1803_v46 = vadd.f32 %v247_v42, %v237_v44 }
 0x19e   :  { %278 = vrot.lane.b32.xlu0 %v1803_v46, %s1753_s0  ;;  %274 = vrot.lane.b32.xlu1 %v1801_v45, %s1753_s0  ;;  %v1563_v23 = vpack.i.bf16 %v1813_v53, %v1801_v45  ;;  %v1558_v28 = vpack.i.bf16 %v1815_v54, %v1803_v46 }
 0x1a0   :  { %v191_v49 = vpop.f32.mrf.mxu3  ;;  %v168_v58 = vpop.f32.mrf.mxu2 }
 0x1a1   :  { %v1809_v52 = vadd.f32 %v243_v47, %v191_v49  ;;  %v1827_v61 = vadd.f32 %v241_v59, %v168_v58 }
 0x1a3   :  { %270 = vrot.lane.b32.xlu2 %v1809_v52, %s1753_s0  ;;  %v1573_v42 = vpack.i.bf16 %v1825_v60, %v1827_v61 }
 0x1a6   :  { %276 = vrot.lane.b32.xlu0 %v1815_v54, %s1753_s0  ;;  %272 = vrot.lane.b32.xlu1 %v1813_v53, %s1753_s0 }
 0x1ab   :  { %268 = vrot.lane.b32.xlu2 %v1821_v57, %s1753_s0 }
 0x1ae   :  { %264 = vrot.lane.b32.xlu1 %v1825_v60, %s1753_s0  ;;  %266 = vrot.lane.b32.xlu0 %v1827_v61, %s1753_s0 }
 0x1fd   :  { %v271_v1 = vpop.permute.xlu2 %270 }
 0x205   :  { %v269_v3 = vpop.permute.xlu2 %268 }
 0x210   :  { %v279_v62 = vpop.permute.xlu0 %278  ;;  %v275_v63 = vpop.permute.xlu1 %274 }
 0x211   :  { %1481 = vmatpush.xpose.msk.msra.mxu2 %vm280_vm1, %v279_v62 }
 0x218   :  { %v277_v0 = vpop.permute.xlu0 %276  ;;  %v273_v2 = vpop.permute.xlu1 %272 }
 0x219   :  { %1482 = vmatpush.xpose.msk.msra.mxu2 %vm280_vm1, %v277_v0 }
 0x21d   :  { %1483 = vmatpush.xpose.msk.msra.mxu2 %vm280_vm1, %v275_v63  ;;  %v1568_v63 = vpack.i.bf16 %v1821_v57, %v1809_v52 }
 0x220   :  { %v267_v4 = vpop.permute.xlu0 %266  ;;  %v265_v5 = vpop.permute.xlu1 %264 }
 0x221   :  { %1484 = vmatpush.xpose.msk.msra.mxu2 %vm280_vm1, %v273_v2 }
 0x225   :  { %1485 = vmatpush.xpose.msk.msra.mxu2 %vm280_vm1, %v271_v1 }
 0x229   :  { %1486 = vmatpush.xpose.msk.msra.mxu2 %vm280_vm1, %v269_v3 }
 0x22d   :  { %1487 = vmatpush.xpose.msk.msra.mxu2 %vm280_vm1, %v267_v4 }
 0x231   :  { %1488 = vmatpush.xpose.msk.msra.mxu2 %vm280_vm1, %v265_v5 }
 0x234   :  { %1489 = vmatmul.msk.f32.vlgmr.msra.gmra.mxu2 %vm280_vm1, %v1825_v60 }
 0x23c   :  { %1490 = vmatmul.msk.f32.gmra.mxu2 %vm280_vm1, %v1827_v61 }
 0x244   :  { %1491 = vmatmul.msk.f32.gmra.mxu2 %vm280_vm1, %v1821_v57 }
 0x24c   :  { %1492 = vmatmul.msk.f32.gmra.mxu2 %vm280_vm1, %v1809_v52 }
 0x254   :  { %1493 = vmatmul.msk.f32.gmra.mxu2 %vm280_vm1, %v1813_v53 }
 0x25c   :  { %1494 = vmatmul.msk.f32.gmra.mxu2 %vm280_vm1, %v1801_v45 }
 0x264   :  { %1495 = vmatmul.msk.f32.gmra.mxu2 %vm280_vm1, %v1815_v54 }
 0x26c   :  { %1496 = vmatmul.msk.f32.gmra.mxu2 %vm280_vm1, %v1803_v46 }
 0x2b7   :  { %v330_v7 = vpop.f32.mrf.mxu2 }
 0x2b8   :  { %v331_v8 = vadd.f32 %v330_v7, %v1857_v6 }
 0x2ba   :  { %v355_v9 = vsel %vm354_vm2, %v331_v8, -inf }
 0x2bb   :  { %356 = vmax.xlane.f32.xlu2 %v355_v9 }
 0x2bf   :  { %v333_v11 = vpop.f32.mrf.mxu2 }
 0x2c0   :  { %v334_v12 = vadd.f32 %v333_v11, %v1861_v10 }
 0x2c2   :  { %v358_v13 = vsel %vm354_vm2, %v334_v12, -inf }
 0x2c3   :  { %359 = vmax.xlane.f32.xlu0 %v358_v13 }
 0x2c7   :  { %v336_v15 = vpop.f32.mrf.mxu2 }
 0x2c8   :  { %v1868_v16 = vadd.f32 %v336_v15, %v1865_v14 }
 0x2ca   :  { %v361_v17 = vsel %vm354_vm2, %v1868_v16, -inf }
 0x2cb   :  { %362 = vmax.xlane.f32.xlu1 %v361_v17 }
 0x2cf   :  { %v339_v19 = vpop.f32.mrf.mxu2 }
 0x2d0   :  { %v340_v20 = vadd.f32 %v339_v19, %v1872_v18 }
 0x2d2   :  { %v364_v21 = vsel %vm354_vm2, %v340_v20, -inf }
 0x2d3   :  { %365 = vmax.xlane.f32.xlu2 %v364_v21 }
 0x2d7   :  { %v342_v24 = vpop.f32.mrf.mxu2  ;;  %1564 = vrot.lane.b32.xlu0 %v1563_v23, %s1754_s1 }
 0x2d8   :  { %v343_v25 = vadd.f32 %v342_v24, %v1876_v22 }
 0x2da   :  { %v367_v26 = vsel %vm354_vm2, %v343_v25, -inf }
 0x2db   :  { %368 = vmax.xlane.f32.xlu2 %v367_v26 }
 0x2df   :  { %v345_v27 = vpop.f32.mrf.mxu2 }
 0x2e0   :  { %v1893_v34 = vadd.f32 %v345_v27, %v1890_v33 }
 0x2e2   :  { %v370_v36 = vsel %vm354_vm2, %v1893_v34, -inf }
 0x2e4   :  { %1559 = vrot.lane.b32.xlu1 %v1558_v28, %s1754_s1 }
 0x2e7   :  { %v348_v30 = vpop.f32.mrf.mxu2 }
 0x2e8   :  { %v349_v31 = vadd.f32 %v348_v30, %v1886_v29 }
 0x2ea   :  { %v373_v32 = vsel %vm354_vm2, %v349_v31, -inf }
 0x2eb   :  { %374 = vmax.xlane.f32.xlu2 %v373_v32 }
 0x2ef   :  { %v351_v39 = vpop.f32.mrf.mxu2 }
 0x2f0   :  { %v1900_v40 = vadd.f32 %v351_v39, %v1897_v38 }
 0x2f2   :  { %v376_v41 = vsel %vm354_vm2, %v1900_v40, -inf }
 0x301   :  { %371 = vmax.xlane.f32.xlu0 %v370_v36 }
 0x30e   :  { %377 = vmax.xlane.f32.xlu1 %v376_v41 }
 0x315   :  { %1574 = vrot.lane.b32.xlu0 %v1573_v42, %s1754_s1 }
 0x32e   :  { %v357_v43 = vpop.xlane.xlu2 %356 }
 0x32f   :  { %v379_v44 = vsub.f32 %v331_v8, %v357_v43 }
 0x331   :  { %v387_v45 = vmul.f32 1.442695, %v379_v44 }
 0x333   :  { %1615 = vpow2.f32 %v387_v45 }
 0x336   :  { %v360_v46 = vpop.xlane.xlu0 %359 }
 0x337   :  { %v380_v47 = vsub.f32 %v334_v12, %v360_v46 }
 0x339   :  { %v1907_v48 = vpop.eup %1615  ;;  %v389_v49 = vmul.f32 1.442695, %v380_v47 }
 0x33a   :  { %v403_v50 = vsel %vm354_vm2, %v1907_v48, 0.0 }
 0x33b   :  { %1617 = vpow2.f32 %v389_v49  ;;  %404 = vadd.xlane.f32.xlu2 %v403_v50 }
 0x33e   :  { %v363_v58 = vpop.xlane.xlu1 %362 }
 0x33f   :  { %v381_v13 = vsub.f32 %v1868_v16, %v363_v58 }
 0x341   :  { %v1911_v51 = vpop.eup %1617  ;;  %v391_v17 = vmul.f32 1.442695, %v381_v13 }
 0x342   :  { %v406_v53 = vsel %vm354_vm2, %v1911_v51, 0.0 }
 0x343   :  { %407 = vadd.xlane.f32.xlu0 %v406_v53 }
 0x346   :  { %v366_v54 = vpop.xlane.xlu2 %365 }
 0x347   :  { %v382_v55 = vsub.f32 %v340_v20, %v366_v54 }
 0x349   :  { %v393_v56 = vmul.f32 1.442695, %v382_v55  ;;  %v1565_v3 = vpop.permute.xlu0 %1564 }
 0x34a   :  { %v1566_v52 = vunpack.i.l.bf16 %v1565_v3  ;;  %v1567_v57 = vunpack.i.h.bf16 %v1565_v3 }
 0x34b   :  { %1619 = vpow2.f32 %v393_v56 }
 0x34e   :  { %v369_v59 = vpop.xlane.xlu2 %368 }
 0x34f   :  { %v383_v60 = vsub.f32 %v343_v25, %v369_v59 }
 0x351   :  { %v1915_v61 = vpop.eup %1619  ;;  %v395_v62 = vmul.f32 1.442695, %v383_v60 }
 0x352   :  { %v412_v0 = vsel %vm354_vm2, %v1915_v61, 0.0 }
 0x353   :  { %1621 = vpow2.f32 %v395_v62  ;;  %1569 = vrot.lane.b32.xlu2 %v1568_v63, %s1754_s1  ;;  %413 = vadd.xlane.f32.xlu1 %v412_v0 }
 0x356   :  { %v1560_v1 = vpop.permute.xlu1 %1559 }
 0x357   :  { %v1561_v2 = vunpack.i.l.bf16 %v1560_v1  ;;  %v1562_v5 = vunpack.i.h.bf16 %v1560_v1 }
 0x359   :  { %v1922_v4 = vpop.eup %1621  ;;  %499 = vmatpush.msrb.mxu3 %v1561_v2 }
 0x35a   :  { %v415_v7 = vsel %vm354_vm2, %v1922_v4, 0.0 }
 0x35b   :  { %500 = vmatpush.msrb.mxu3 %v1562_v5  ;;  %416 = vadd.xlane.f32.xlu1 %v415_v7 }
 0x35d   :  { %501 = vmatpush.msrb.mxu3 %v1566_v52 }
 0x35e   :  { %v375_v8 = vpop.xlane.xlu2 %374 }
 0x35f   :  { %v385_v9 = vsub.f32 %v349_v31, %v375_v8  ;;  %502 = vmatpush.msrb.mxu3 %v1567_v57 }
 0x361   :  { %v399_v11 = vmul.f32 1.442695, %v385_v9 }
 0x363   :  { %1623 = vpow2.f32 %v399_v11 }
 0x364   :  { %1625 = vpow2.f32 %v391_v17 }
 0x369   :  { %v1926_v12 = vpop.eup %1623 }
 0x36a   :  { %v421_v15 = vsel %vm354_vm2, %v1926_v12, 0.0  ;;  %v1626_v23 = vpop.eup %1625 }
 0x36b   :  { %422 = vadd.xlane.f32.xlu1 %v421_v15  ;;  %v409_v24 = vsel %vm354_vm2, %v1626_v23, 0.0 }
 0x374   :  { %v372_v19 = vpop.xlane.xlu0 %371 }
 0x375   :  { %v384_v20 = vsub.f32 %v1893_v34, %v372_v19  ;;  %v1600_v19 = vld [vmem:[#allocation4 + $0x150] ss:$0 sm:$0xff] }
 0x377   :  { %v397_v21 = vmul.f32 1.442695, %v384_v20 }
 0x379   :  { %1627 = vpow2.f32 %v397_v21 }
 0x37c   :  { %410 = vadd.xlane.f32.xlu2 %v409_v24 }
 0x37f   :  { %v1628_v25 = vpop.eup %1627 }
 0x380   :  { %v418_v26 = vsel %vm354_vm2, %v1628_v25, 0.0 }
 0x381   :  { %v378_v27 = vpop.xlane.xlu1 %377  ;;  %419 = vadd.xlane.f32.xlu0 %v418_v26 }
 0x382   :  { %v386_v16 = vsub.f32 %v1900_v40, %v378_v27 }
 0x384   :  { %v401_v28 = vmul.f32 1.442695, %v386_v16 }
 0x386   :  { %1629 = vpow2.f32 %v401_v28 }
 0x387   :  { %v1575_v34 = vpop.permute.xlu0 %1574 }
 0x388   :  { %v1576_v44 = vunpack.i.l.bf16 %v1575_v34  ;;  %v1577_v40 = vunpack.i.h.bf16 %v1575_v34 }
 0x38c   :  { %v1630_v30 = vpop.eup %1629 }
 0x38d   :  { %v424_v31 = vsel %vm354_vm2, %v1630_v30, 0.0 }
 0x38e   :  { %425 = vadd.xlane.f32.xlu0 %v424_v31 }
 0x3ae   :  { %v405_v32 = vpop.xlane.xlu2 %404 }
 0x3af   :  { %1631 = vrcp.f32 %v405_v32 }
 0x3b5   :  { %v1632_v43 = vpop.eup %1631 }
 0x3b6   :  { %v1570_v36 = vpop.permute.xlu2 %1569  ;;  %v408_v42 = vpop.xlane.xlu0 %407  ;;  %v435_v45 = vmul.f32 %v1632_v43, %v1907_v48 }
 0x3b7   :  { %v1571_v39 = vunpack.i.l.bf16 %v1570_v36  ;;  %v1572_v41 = vunpack.i.h.bf16 %v1570_v36  ;;  %1633 = vrcp.f32 %v408_v42  ;;  %v1755_v42 = vmov 32.0  }
 0x3b9   :  { %503 = vmatpush.msrb.mxu3 %v1571_v39 }
 0x3bb   :  { %504 = vmatpush.msrb.mxu3 %v1572_v41 }
 0x3bd   :  { %505 = vmatpush.msrb.mxu3 %v1576_v44  ;;  %v1634_v46 = vpop.eup %1633 }
 0x3be   :  { %v436_v47 = vmul.f32 %v1634_v46, %v1911_v51 }
 0x3bf   :  { %506 = vmatpush.msrb.mxu3 %v1577_v40 }
 0x3c0   :  { %1497 = vmatmul.msk.f32.vlgmr.msrb.gmra.mxu3 %vm354_vm2, %v435_v45 }
 0x3c6   :  { %v414_v50 = vpop.xlane.xlu1 %413 }
 0x3c8   :  { %1498 = vmatmul.msk.f32.gmra.mxu3 %vm354_vm2, %v436_v47 }
 0x3ce   :  { %v417_v55 = vpop.xlane.xlu1 %416 }
 0x3de   :  { %v423_v60 = vpop.xlane.xlu1 %422 }
 0x3ef   :  { %v411_v49 = vpop.xlane.xlu2 %410 }
 0x3f0   :  { %1635 = vrcp.f32 %v411_v49 }
 0x3f1   :  { %1637 = vrcp.f32 %v414_v50 }
 0x3f2   :  { %1639 = vrcp.f32 %v417_v55 }
 0x3f4   :  { %v420_v58 = vpop.xlane.xlu0 %419 }
 0x3f5   :  { %1641 = vrcp.f32 %v420_v58 }
 0x3f6   :  { %v1636_v53 = vpop.eup %1635  ;;  %1643 = vrcp.f32 %v423_v60  ;;  %v612_v60 = vld [vmem:[#allocation4 + $0x160] sm:$0xff] }
 0x3f7   :  { %v437_v54 = vmul.f32 %v1636_v53, %v1626_v23  ;;  %v1638_v56 = vpop.eup %1637 }
 0x3f8   :  { %v438_v48 = vmul.f32 %v1638_v56, %v1915_v61  ;;  %v1640_v59 = vpop.eup %1639 }
 0x3f9   :  { %1499 = vmatmul.msk.f32.gmra.mxu3 %vm354_vm2, %v437_v54  ;;  %v439_v51 = vmul.f32 %v1640_v59, %v1922_v4  ;;  %v614_v59 = vld [vmem:[#allocation4 + $0x170] sm:$0xff] }
 0x3fa   :  { %635 = vmatpush.msra.mxu0 %v614_v59 }
 0x3fb   :  { %v1642_v62 = vpop.eup %1641 }
 0x3fc   :  { %v440_v63 = vmul.f32 %v1642_v62, %v1628_v25  ;;  %v1644_v1 = vpop.eup %1643  ;;  %v611_v62 = vld [vmem:[#allocation4 + $0x158] sm:$0xff] }
 0x3fd   :  { %v441_v61 = vmul.f32 %v1644_v1, %v1926_v12 }
 0x401   :  { %1500 = vmatmul.msk.f32.gmra.mxu3 %vm354_vm2, %v438_v48  ;;  %v426_v0 = vpop.xlane.xlu0 %425 }
 0x402   :  { %1645 = vrcp.f32 %v426_v0 }
 0x403   :  { %1647 = vrcp.f32 %v1755_v42  ;;  %v651_v42 = vld [vmem:[#allocation4 + $0x198] sm:$0xff] }
 0x408   :  { %v1646_v2 = vpop.eup %1645 }
 0x409   :  { %1501 = vmatmul.msk.f32.gmra.mxu3 %vm354_vm2, %v439_v51  ;;  %v442_v3 = vmul.f32 %v1646_v2, %v1630_v30  ;;  %v1648_v43 = vpop.eup %1647  ;;  %v613_v51 = vld [vmem:[#allocation4 + $0x168] sm:$0xff]  ;;  %v662_v2 = vld [vmem:[#allocation4 + $0x1f0] sm:$0xff] }
 0x40a   :  { %v561_v44 = vmul.f32 32.0, %v1648_v43  ;;  %vm565_vm3 = vweird.f32 %v1648_v43  ;;  %636 = vmatpush.msra.mxu0 %v613_v51 }
 0x40c   :  { %v562_v40 = vsub.f32 1.0, %v561_v44  ;;  %637 = vmatpush.msra.mxu0 %v612_v60 }
 0x40e   :  { %638 = vmatpush.msra.mxu0 %v611_v62 }
 0x411   :  { %1502 = vmatmul.msk.f32.gmra.mxu3 %vm354_vm2, %v440_v63 }
 0x419   :  { %1503 = vmatmul.msk.f32.gmra.mxu3 %vm354_vm2, %v441_v61  ;;  %v663_v61 = vld [vmem:[#allocation4 + $0x1f8] sm:$0xff] }
 0x41a   :  { %666 = vmatpush.msra.mxu1 %v663_v61 }
 0x41c   :  { %667 = vmatpush.msra.mxu1 %v662_v2 }
 0x421   :  { %1504 = vmatmul.msk.f32.gmra.mxu3 %vm354_vm2, %v442_v3  ;;  %v661_v3 = vld [vmem:[#allocation4 + $0x1e8] sm:$0xff] }
 0x422   :  { %668 = vmatpush.msra.mxu1 %v661_v3 }
 0x443   :  { %v508_v4 = vpop.f32.mrf.mxu3 }
 0x444   :  { %v532_v11 = vsel %vm51_vm0, %v508_v4, 0.0 }
 0x44b   :  { %v511_v5 = vpop.f32.mrf.mxu3 }
 0x44c   :  { %v539_v25 = vsel %vm51_vm0, %v511_v5, 0.0 }
 0x47c   :  { %v514_v7 = vpop.f32.mrf.mxu3 }
 0x47d   :  { %v533_v9 = vsel %vm51_vm0, %v514_v7, 0.0  ;;  %v660_v7 = vld [vmem:[#allocation4 + $0x1e0] sm:$0xff] }
 0x47e   :  { %v534_v15 = vadd.f32 %v533_v9, %v532_v11  ;;  %669 = vmatpush.msra.mxu1 %v660_v7  ;;  %v658_v11 = vld [vmem:[#allocation4 + $0x1d0] sm:$0xff] }
 0x484   :  { %v517_v52 = vpop.f32.mrf.mxu3 }
 0x485   :  { %v540_v23 = vsel %vm51_vm0, %v517_v52, 0.0 }
 0x486   :  { %v541_v27 = vadd.f32 %v540_v23, %v539_v25  ;;  %v1601_v25 = vld [vmem:[#allocation4 + $0x208] ss:$0 sm:$0xff] }
 0x48c   :  { %v520_v57 = vpop.f32.mrf.mxu3 }
 0x48d   :  { %v535_v13 = vsel %vm51_vm0, %v520_v57, 0.0 }
 0x48e   :  { %v536_v12 = vadd.f32 %v535_v13, %v534_v15  ;;  %v657_v15 = vld [vmem:[#allocation4 + $0x1c8] sm:$0xff] }
 0x494   :  { %v523_v8 = vpop.f32.mrf.mxu3 }
 0x495   :  { %v542_v26 = vsel %vm51_vm0, %v523_v8, 0.0  ;;  %v659_v8 = vld [vmem:[#allocation4 + $0x1d8] sm:$0xff] }
 0x496   :  { %v543_v28 = vadd.f32 %v542_v26, %v541_v27  ;;  %670 = vmatpush.msra.mxu1 %v659_v8  ;;  %v654_v26 = vld [vmem:[#allocation4 + $0x1b0] sm:$0xff] }
 0x498   :  { %671 = vmatpush.msra.mxu1 %v658_v11 }
 0x49a   :  { %672 = vmatpush.msra.mxu1 %v657_v15  ;;  %v746_v15 = vld [vmem:[#allocation4 + $0x240] sm:$0xff] }
 0x49b   :  { %777 = vmatpush.msrb.mxu0 %v746_v15 }
 0x49c   :  { %v526_v17 = vpop.f32.mrf.mxu3 }
 0x49d   :  { %v537_v20 = vsel %vm51_vm0, %v526_v17, 0.0  ;;  %v656_v17 = vld [vmem:[#allocation4 + $0x1c0] sm:$0xff] }
 0x49e   :  { %v538_v21 = vadd.f32 %v537_v20, %v536_v12  ;;  %673 = vmatpush.msra.mxu1 %v656_v17  ;;  %v745_v17 = vld [vmem:[#allocation4 + $0x238] sm:$0xff] }
 0x49f   :  { %778 = vmatpush.msrb.mxu0 %v745_v17  ;;  %v860_v17 = vld [vmem:[#allocation4 + $0x2c0] sm:$0xff] }
 0x4a0   :  { %v548_v24 = vadd.f32 %v1600_v19, %v538_v21  ;;  %v655_v21 = vld [vmem:[#allocation4 + $0x1b8] sm:$0xff] }
 0x4a1   :  { %674 = vmatpush.msra.mxu1 %v655_v21  ;;  %v752_v21 = vld [vmem:[#allocation4 + $0x270] sm:$0xff] }
 0x4a2   :  { %v550_v16 = vadd.f32 %v548_v24, %v1781_v35  ;;  %v563_v35 = vmul.f32 %v1648_v43, %v562_v40 }
 0x4a3   :  { %675 = vmatpush.msra.mxu1 %v654_v26 }
 0x4a4   :  { %v529_v30 = vpop.f32.mrf.mxu3  ;;  %v554_v31 = vsel %vm51_vm0, %v550_v16, 0.0  ;;  %v564_v45 = vadd.f32 %v1648_v43, %v563_v35 }
 0x4a5   :  { %v544_v32 = vsel %vm51_vm0, %v529_v30, 0.0  ;;  %555 = vadd.xlane.f32.xlu2 %v554_v31  ;;  %v1602_v30 = vld [vmem:[#allocation4 + $0x210] ss:$0 sm:$0xff]  ;;  %v653_v31 = vld [vmem:[#allocation4 + $0x1a8] sm:$0xff] }
 0x4a6   :  { %v545_v34 = vadd.f32 %v544_v32, %v543_v28  ;;  %v1961_v46 = vsel %vm565_vm3, %v1648_v43, %v564_v45  ;;  %676 = vmatpush.msra.mxu1 %v653_v31 }
 0x4a8   :  { %v549_v36 = vadd.f32 %v1600_v19, %v545_v34 }
 0x4aa   :  { %v551_v39 = vadd.f32 %v549_v36, %v1791_v37  ;;  %v652_v36 = vld [vmem:[#allocation4 + $0x1a0] sm:$0xff] }
 0x4ab   :  { %677 = vmatpush.msra.mxu1 %v652_v36 }
 0x4ac   :  { %v557_v41 = vsel %vm51_vm0, %v551_v39, 0.0 }
 0x4ad   :  { %558 = vadd.xlane.f32.xlu1 %v557_v41  ;;  %678 = vmatpush.msra.mxu1 %v651_v42 }
 0x518   :  { %v556_v47 = vpop.xlane.xlu2 %555 }
 0x519   :  { %v567_v49 = vmul.f32 %v1961_v46, %v556_v47  ;;  %v650_v47 = vld [vmem:[#allocation4 + $0x190] sm:$0xff] }
 0x51a   :  { %679 = vmatpush.msra.mxu1 %v650_v47  ;;  %v1605_v47 = vld [vmem:[#allocation4 + $0x218] ss:$0 sm:$0xff] }
 0x51b   :  { %v569_v50 = vsub.f32 %v550_v16, %v567_v49  ;;  %v649_v49 = vld [vmem:[#allocation4 + $0x188] sm:$0xff] }
 0x51c   :  { %680 = vmatpush.msra.mxu1 %v649_v49 }
 0x51d   :  { %v571_v53 = vmul.f32 %v569_v50, %v569_v50 }
 0x51f   :  { %v573_v37 = vsel %vm51_vm0, %v571_v53, 0.0  ;;  %v1603_v53 = vld [vmem:[#allocation4 + $0x178] ss:$0 sm:$0xff] }
 0x520   :  { %574 = vadd.xlane.f32.xlu0 %v573_v37  ;;  %v559_v54 = vpop.xlane.xlu1 %558 }
 0x521   :  { %v568_v55 = vmul.f32 %v1961_v46, %v559_v54 }
 0x523   :  { %v1966_v56 = vsub.f32 %v551_v39, %v568_v55 }
 0x525   :  { %v572_v48 = vmul.f32 %v1966_v56, %v1966_v56 }
 0x527   :  { %v576_v58 = vsel %vm51_vm0, %v572_v48, 0.0 }
 0x528   :  { %577 = vadd.xlane.f32.xlu2 %v576_v58 }
 0x593   :  { %v575_v63 = vpop.xlane.xlu0 %574 }
 0x594   :  { %v579_v0 = vmul.f32 %v575_v63, %v1961_v46 }
 0x596   :  { %v581_v1 = vadd.f32 1e-05, %v579_v0 }
 0x598   :  { %1649 = vrsqrt.f32 %v581_v1  ;;  %vm589_vm5 = vweird.f32 %v581_v1 }
 0x59b   :  { %v578_v4 = vpop.xlane.xlu2 %577 }
 0x59c   :  { %v580_v5 = vmul.f32 %v578_v4, %v1961_v46 }
 0x59e   :  { %v1650_v52 = vpop.eup %1649  ;;  %v582_v57 = vadd.f32 1e-05, %v580_v5 }
 0x59f   :  { %v584_v9 = vmul.f32 %v1650_v52, %v581_v1  ;;  %vm590_vm4 = vweird.f32 %v1650_v52 }
 0x5a0   :  { %1651 = vrsqrt.f32 %v582_v57  ;;  %vm591_vm6 = vmor %vm589_vm5, %vm590_vm4  ;;  %vm599_vm8 = vweird.f32 %v582_v57 }
 0x5a1   :  { %v585_v13 = vmul.f32 %v1650_v52, %v584_v9 }
 0x5a3   :  { %v586_v12 = vmul.f32 0.5, %v585_v13 }
 0x5a5   :  { %v587_v19 = vsub.f32 1.5, %v586_v12  ;;  %v754_v12 = vld [vmem:[#allocation4 + $0x280] sm:$0xff] }
 0x5a6   :  { %v1652_v20 = vpop.eup %1651 }
 0x5a7   :  { %v588_v23 = vmul.f32 %v1650_v52, %v587_v19  ;;  %v594_v24 = vmul.f32 %v1652_v20, %v582_v57  ;;  %vm600_vm7 = vweird.f32 %v1652_v20  ;;  %v753_v19 = vld [vmem:[#allocation4 + $0x278] sm:$0xff] }
 0x5a8   :  { %vm601_vm9 = vmor %vm599_vm8, %vm600_vm7 }
 0x5a9   :  { %v592_v27 = vsel %vm591_vm6, %v1650_v52, %v588_v23  ;;  %v595_v16 = vmul.f32 %v1652_v20, %v594_v24  ;;  %v743_v23 = vld [vmem:[#allocation4 + $0x228] sm:$0xff] }
 0x5aa   :  { %v603_v28 = vmul.f32 %v592_v27, %v569_v50  ;;  %v648_v50 = vld [vmem:[#allocation4 + $0x180] sm:$0xff]  ;;  %v751_v24 = vld [vmem:[#allocation4 + $0x268] sm:$0xff] }
 0x5ab   :  { %v596_v32 = vmul.f32 0.5, %v595_v16  ;;  %681 = vmatpush.msra.mxu1 %v648_v50  ;;  %v750_v16 = vld [vmem:[#allocation4 + $0x260] sm:$0xff] }
 0x5ac   :  { %v606_v34 = vmul.f32 %v1601_v25, %v603_v28  ;;  %v749_v28 = vld [vmem:[#allocation4 + $0x258] sm:$0xff] }
 0x5ad   :  { %v597_v39 = vsub.f32 1.5, %v596_v32  ;;  %823 = vmatpush.msrb.mxu1 %v754_v12 }
 0x5ae   :  { %v609_v41 = vadd.f32 %v1602_v30, %v606_v34  ;;  %v747_v34 = vld [vmem:[#allocation4 + $0x248] sm:$0xff] }
 0x5af   :  { %v598_v43 = vmul.f32 %v1652_v20, %v597_v39  ;;  %824 = vmatpush.msrb.mxu1 %v753_v19  ;;  %v864_v19 = vld [vmem:[#allocation4 + $0x2e0] sm:$0xff] }
 0x5b0   :  { %1505 = vmatmul.msk.f32.vlgmr.msra.gmra.mxu0 %vm51_vm0, %v609_v41 }
 0x5b1   :  { %v602_v44 = vsel %vm601_vm9, %v1652_v20, %v598_v43  ;;  %v744_v20 = vld [vmem:[#allocation4 + $0x230] sm:$0xff]  ;;  %825 = vmatpush.msrb.mxu1 %v752_v21 }
 0x5b2   :  { %v604_v40 = vmul.f32 %v602_v44, %v1966_v56  ;;  %v1604_v56 = vld [vmem:[#allocation4 + $0x200] ss:$0 sm:$0xff]  ;;  %779 = vmatpush.msrb.mxu0 %v744_v20 }
 0x5b3   :  { %826 = vmatpush.msrb.mxu1 %v751_v24  ;;  %v857_v24 = vld [vmem:[#allocation4 + $0x2a8] sm:$0xff] }
 0x5b4   :  { %v607_v35 = vmul.f32 %v1601_v25, %v604_v40  ;;  %780 = vmatpush.msrb.mxu0 %v743_v23 }
 0x5b6   :  { %v610_v45 = vadd.f32 %v1602_v30, %v607_v35  ;;  %800 = vmatpush.msra.mxu0 %v750_v16  ;;  %v748_v30 = vld [vmem:[#allocation4 + $0x250] sm:$0xff]  ;;  %v859_v16 = vld [vmem:[#allocation4 + $0x2b8] sm:$0xff] }
 0x5b8   :  { %1506 = vmatmul.msk.f32.gmra.mxu0 %vm51_vm0, %v610_v45 }
 0x5b9   :  { %801 = vmatpush.msra.mxu0 %v749_v28 }
 0x5bb   :  { %802 = vmatpush.msra.mxu0 %v748_v30 }
 0x5bd   :  { %803 = vmatpush.msra.mxu0 %v747_v34 }
 0x62d   :  { %v640_v37 = vpop.f32.mrf.mxu0 }
 0x62e   :  { %v641_v54 = vadd.f32 %v1603_v53, %v640_v37  ;;  %v1606_v37 = vld [vmem:[#allocation4 + $0x220] ss:$0 sm:$0xff] }
 0x630   :  { %v646_v55 = vmax.f32 %v641_v54, 0.0 }
 0x632   :  { %682 = vmatmul.f32.vlgmr.msra.gmra.mxu1 %v646_v55 }
 0x635   :  { %v643_v48 = vpop.f32.mrf.mxu0 }
 0x636   :  { %v644_v58 = vadd.f32 %v1603_v53, %v643_v48 }
 0x638   :  { %v647_v59 = vmax.f32 %v644_v58, 0.0 }
 0x63a   :  { %685 = vmatmul.f32.gmra.mxu1 %v647_v59  ;;  %v758_v59 = vld [vmem:[#allocation4 + $0x2a0] sm:$0xff] }
 0x6af   :  { %v683_v51 = vpop.f32.mrf.mxu1 }
 0x6b0   :  { %v684_v60 = vadd.f32 %v1604_v56, %v683_v51  ;;  %v757_v51 = vld [vmem:[#allocation4 + $0x298] sm:$0xff] }
 0x6b2   :  { %v689_v62 = vadd.f32 %v684_v60, %v609_v41 }
 0x6b4   :  { %v693_v63 = vsel %vm51_vm0, %v689_v62, 0.0 }
 0x6b5   :  { %694 = vadd.xlane.f32.xlu1 %v693_v63  ;;  %v756_v63 = vld [vmem:[#allocation4 + $0x290] sm:$0xff] }
 0x6b7   :  { %v686_v0 = vpop.f32.mrf.mxu1 }
 0x6b8   :  { %v687_v1 = vadd.f32 %v1604_v56, %v686_v0 }
 0x6ba   :  { %v690_v61 = vadd.f32 %v687_v1, %v610_v45  ;;  %v755_v1 = vld [vmem:[#allocation4 + $0x288] sm:$0xff] }
 0x6bc   :  { %v696_v2 = vsel %vm51_vm0, %v690_v61, 0.0 }
 0x6bd   :  { %697 = vadd.xlane.f32.xlu0 %v696_v2 }
 0x728   :  { %v695_v3 = vpop.xlane.xlu1 %694 }
 0x729   :  { %v699_v4 = vmul.f32 %v695_v3, %v1961_v46 }
 0x72b   :  { %v701_v5 = vsub.f32 %v689_v62, %v699_v4  ;;  %v862_v4 = vld [vmem:[#allocation4 + $0x2d0] sm:$0xff] }
 0x72d   :  { %v703_v7 = vmul.f32 %v701_v5, %v701_v5 }
 0x72f   :  { %v705_v52 = vsel %vm51_vm0, %v703_v7, 0.0 }
 0x730   :  { %v698_v57 = vpop.xlane.xlu0 %697  ;;  %706 = vadd.xlane.f32.xlu2 %v705_v52 }
 0x731   :  { %v700_v8 = vmul.f32 %v698_v57, %v1961_v46  ;;  %v858_v57 = vld [vmem:[#allocation4 + $0x2b0] sm:$0xff] }
 0x733   :  { %v1981_v9 = vsub.f32 %v690_v61, %v700_v8 }
 0x735   :  { %v704_v11 = vmul.f32 %v1981_v9, %v1981_v9 }
 0x737   :  { %v708_v13 = vsel %vm51_vm0, %v704_v11, 0.0 }
 0x738   :  { %709 = vadd.xlane.f32.xlu1 %v708_v13  ;;  %v863_v13 = vld [vmem:[#allocation4 + $0x2d8] sm:$0xff] }
 0x7a3   :  { %v707_v25 = vpop.xlane.xlu2 %706 }
 0x7a4   :  { %v711_v26 = vmul.f32 %v707_v25, %v1961_v46  ;;  %v861_v25 = vld [vmem:[#allocation4 + $0x2c8] sm:$0xff] }
 0x7a6   :  { %v713_v27 = vadd.f32 1e-05, %v711_v26 }
 0x7a8   :  { %1653 = vrsqrt.f32 %v713_v27  ;;  %vm721_vm11 = vweird.f32 %v713_v27 }
 0x7ab   :  { %v710_v31 = vpop.xlane.xlu1 %709 }
 0x7ac   :  { %v712_v32 = vmul.f32 %v710_v31, %v1961_v46 }
 0x7ae   :  { %v1654_v36 = vpop.eup %1653  ;;  %v714_v39 = vadd.f32 1e-05, %v712_v32 }
 0x7af   :  { %v716_v41 = vmul.f32 %v1654_v36, %v713_v27  ;;  %vm722_vm10 = vweird.f32 %v1654_v36 }
 0x7b0   :  { %1655 = vrsqrt.f32 %v714_v39  ;;  %vm723_vm12 = vmor %vm721_vm11, %vm722_vm10  ;;  %vm731_vm14 = vweird.f32 %v714_v39 }
 0x7b1   :  { %v717_v42 = vmul.f32 %v1654_v36, %v716_v41 }
 0x7b3   :  { %v718_v43 = vmul.f32 0.5, %v717_v42 }
 0x7b5   :  { %v719_v44 = vsub.f32 1.5, %v718_v43 }
 0x7b6   :  { %v1656_v40 = vpop.eup %1655 }
 0x7b7   :  { %v720_v35 = vmul.f32 %v1654_v36, %v719_v44  ;;  %v726_v45 = vmul.f32 %v1656_v40, %v714_v39  ;;  %vm732_vm13 = vweird.f32 %v1656_v40 }
 0x7b8   :  { %vm733_vm15 = vmor %vm731_vm14, %vm732_vm13 }
 0x7b9   :  { %v724_v49 = vsel %vm723_vm12, %v1654_v36, %v720_v35  ;;  %v727_v50 = vmul.f32 %v1656_v40, %v726_v45 }
 0x7ba   :  { %v735_v53 = vmul.f32 %v724_v49, %v701_v5 }
 0x7bb   :  { %v728_v54 = vmul.f32 0.5, %v727_v50 }
 0x7bc   :  { %v738_v55 = vmul.f32 %v1605_v47, %v735_v53 }
 0x7bd   :  { %v729_v48 = vsub.f32 1.5, %v728_v54 }
 0x7be   :  { %v1988_v58 = vadd.f32 %v1606_v37, %v738_v55 }
 0x7bf   :  { %v730_v56 = vmul.f32 %v1656_v40, %v729_v48 }
 0x7c0   :  { %1507 = vmatmul.msk.f32.vlgmr.msrb.gmra.mxu0 %vm51_vm0, %v1988_v58  ;;  %1511 = vmatmul.msk.f32.vlgmr.msrb.gmra.mxu1 %vm51_vm0, %v1988_v58 }
 0x7c1   :  { %v734_v60 = vsel %vm733_vm15, %v1656_v40, %v730_v56  ;;  %846 = vmatpush.msrb.mxu0 %v758_v59 }
 0x7c2   :  { %v736_v62 = vmul.f32 %v734_v60, %v1981_v9 }
 0x7c3   :  { %847 = vmatpush.msrb.mxu0 %v757_v51 }
 0x7c4   :  { %v739_v0 = vmul.f32 %v1605_v47, %v736_v62 }
 0x7c5   :  { %848 = vmatpush.msrb.mxu0 %v756_v63 }
 0x7c6   :  { %v1995_v61 = vadd.f32 %v1606_v37, %v739_v0 }
 0x7c7   :  { %849 = vmatpush.msrb.mxu0 %v755_v1 }
 0x7c8   :  { %1508 = vmatmul.msk.f32.gmra.mxu0 %vm51_vm0, %v1995_v61  ;;  %1512 = vmatmul.msk.f32.gmra.mxu1 %vm51_vm0, %v1995_v61 }
 0x7d0   :  { %1509 = vmatmul.msk.f32.vlgmr.msra.gmra.mxu0 %vm51_vm0, %v1988_v58 }
 0x7d8   :  { %1510 = vmatmul.msk.f32.gmra.mxu0 %vm51_vm0, %v1995_v61 }
 0x7e0   :  { %1513 = vmatmul.msk.f32.vlgmr.msrb.gmra.mxu0 %vm51_vm0, %v1988_v58 }
 0x7e8   :  { %1514 = vmatmul.msk.f32.gmra.mxu0 %vm51_vm0, %v1995_v61 }
 0x83d   :  { %v782_v2 = vpop.f32.mrf.mxu0  ;;  %v828_v3 = vpop.f32.mrf.mxu1 }
 0x83e   :  { %v2026_v26 = vadd.f32 %v857_v24, %v782_v2  ;;  %v869_v27 = vadd.f32 %v861_v25, %v828_v3 }
 0x845   :  { %v785_v5 = vpop.f32.mrf.mxu0  ;;  %v831_v7 = vpop.f32.mrf.mxu1 }
 0x846   :  { %v2009_v52 = vadd.f32 %v862_v4, %v831_v7  ;;  %v2013_v9 = vadd.f32 %v858_v57, %v785_v5 }
 0x848   :  { %891 = vrot.lane.b32.xlu1 %v2009_v52, %s1753_s0 }
 0x84d   :  { %v805_v8 = vpop.f32.mrf.mxu0 }
 0x84e   :  { %v2031_v28 = vadd.f32 %v859_v16, %v805_v8 }
 0x850   :  { %883 = vrot.lane.b32.xlu1 %v2013_v9, %s1753_s0 }
 0x855   :  { %v808_v11 = vpop.f32.mrf.mxu0 }
 0x856   :  { %v2021_v21 = vadd.f32 %v860_v17, %v808_v11 }
 0x858   :  { %v1588_v24 = vpack.i.bf16 %v2031_v28, %v2021_v21 }
 0x85d   :  { %v851_v15 = vpop.f32.mrf.mxu0 }
 0x85e   :  { %v2017_v12 = vadd.f32 %v863_v13, %v851_v15 }
 0x860   :  { %893 = vrot.lane.b32.xlu2 %v2017_v12, %s1753_s0 }
 0x865   :  { %v854_v20 = vpop.f32.mrf.mxu0 }
 0x866   :  { %v872_v23 = vadd.f32 %v864_v19, %v854_v20 }
 0x868   :  { %887 = vrot.lane.b32.xlu2 %v2021_v21, %s1753_s0  ;;  %895 = vrot.lane.b32.xlu0 %v872_v23, %s1753_s0  ;;  %v1578_v56 = vpack.i.bf16 %v2017_v12, %v872_v23 }
 0x870   :  { %881 = vrot.lane.b32.xlu2 %v2026_v26, %s1753_s0  ;;  %889 = vrot.lane.b32.xlu0 %v869_v27, %s1753_s0 }
 0x878   :  { %885 = vrot.lane.b32.xlu0 %v2031_v28, %s1753_s0 }
 0x8ba   :  { %v894_v31 = vpop.permute.xlu2 %893  ;;  %v892_v32 = vpop.permute.xlu1 %891 }
 0x8c2   :  { %v888_v36 = vpop.permute.xlu2 %887  ;;  %v884_v41 = vpop.permute.xlu1 %883 }
 0x8ca   :  { %v882_v42 = vpop.permute.xlu2 %881 }
 0x8da   :  { %v896_v30 = vpop.permute.xlu0 %895 }
 0x8db   :  { %1515 = vmatpush.xpose.msk.msra.mxu3 %vm280_vm1, %v896_v30 }
 0x8df   :  { %1516 = vmatpush.xpose.msk.msra.mxu3 %vm280_vm1, %v894_v31 }
 0x8e2   :  { %v890_v34 = vpop.permute.xlu0 %889 }
 0x8e3   :  { %1517 = vmatpush.xpose.msk.msra.mxu3 %vm280_vm1, %v892_v32 }
 0x8e7   :  { %1518 = vmatpush.xpose.msk.msra.mxu3 %vm280_vm1, %v890_v34 }
 0x8ea   :  { %v886_v39 = vpop.permute.xlu0 %885 }
 0x8eb   :  { %1519 = vmatpush.xpose.msk.msra.mxu3 %vm280_vm1, %v888_v36 }
 0x8ef   :  { %1520 = vmatpush.xpose.msk.msra.mxu3 %vm280_vm1, %v886_v39 }
 0x8f3   :  { %1521 = vmatpush.xpose.msk.msra.mxu3 %vm280_vm1, %v884_v41 }
 0x8f7   :  { %1522 = vmatpush.xpose.msk.msra.mxu3 %vm280_vm1, %v882_v42 }
 0x8fa   :  { %1523 = vmatmul.msk.f32.vlgmr.msra.gmra.mxu3 %vm280_vm1, %v2026_v26 }
 0x902   :  { %1524 = vmatmul.msk.f32.gmra.mxu3 %vm280_vm1, %v2013_v9 }
 0x90a   :  { %1525 = vmatmul.msk.f32.gmra.mxu3 %vm280_vm1, %v2031_v28 }
 0x912   :  { %1526 = vmatmul.msk.f32.gmra.mxu3 %vm280_vm1, %v2021_v21 }
 0x91a   :  { %1527 = vmatmul.msk.f32.gmra.mxu3 %vm280_vm1, %v869_v27 }
 0x922   :  { %1528 = vmatmul.msk.f32.gmra.mxu3 %vm280_vm1, %v2009_v52 }
 0x92a   :  { %1529 = vmatmul.msk.f32.gmra.mxu3 %vm280_vm1, %v2017_v12 }
 0x932   :  { %1530 = vmatmul.msk.f32.gmra.mxu3 %vm280_vm1, %v872_v23 }
 0x97d   :  { %v946_v43 = vpop.f32.mrf.mxu3 }
 0x97e   :  { %v947_v44 = vadd.f32 %v946_v43, %v1857_v6 }
 0x980   :  { %v970_v40 = vsel %vm354_vm2, %v947_v44, -inf }
 0x981   :  { %971 = vmax.xlane.f32.xlu0 %v970_v40 }
 0x985   :  { %v949_v35 = vpop.f32.mrf.mxu3 }
 0x986   :  { %v950_v45 = vadd.f32 %v949_v35, %v1861_v10 }
 0x988   :  { %v973_v47 = vsel %vm354_vm2, %v950_v45, -inf }
 0x989   :  { %974 = vmax.xlane.f32.xlu1 %v973_v47 }
 0x98d   :  { %v952_v49 = vpop.f32.mrf.mxu3 }
 0x98e   :  { %v2062_v50 = vadd.f32 %v952_v49, %v1865_v14  ;;  %v1583_v14 = vpack.i.bf16 %v869_v27, %v2009_v52 }
 0x990   :  { %v976_v53 = vsel %vm354_vm2, %v2062_v50, -inf }
 0x991   :  { %977 = vmax.xlane.f32.xlu2 %v976_v53 }
 0x995   :  { %v955_v37 = vpop.f32.mrf.mxu3 }
 0x996   :  { %v956_v6 = vadd.f32 %v955_v37, %v1872_v18 }
 0x998   :  { %v979_v54 = vsel %vm354_vm2, %v956_v6, -inf }
 0x999   :  { %980 = vmax.xlane.f32.xlu0 %v979_v54 }
 0x99d   :  { %v958_v55 = vpop.f32.mrf.mxu3 }
 0x99e   :  { %v959_v10 = vadd.f32 %v958_v55, %v1876_v22 }
 0x9a0   :  { %v982_v48 = vsel %vm354_vm2, %v959_v10, -inf }
 0x9a1   :  { %983 = vmax.xlane.f32.xlu1 %v982_v48 }
 0x9a5   :  { %v961_v59 = vpop.f32.mrf.mxu3 }
 0x9a6   :  { %v2077_v22 = vadd.f32 %v961_v59, %v1890_v33 }
 0x9a8   :  { %v985_v63 = vsel %vm354_vm2, %v2077_v22, -inf }
 0x9a9   :  { %1584 = vrot.lane.b32.xlu2 %v1583_v14, %s1754_s1 }
 0x9ad   :  { %v964_v51 = vpop.f32.mrf.mxu3  ;;  %1579 = vrot.lane.b32.xlu0 %v1578_v56, %s1754_s1 }
 0x9ae   :  { %v965_v18 = vadd.f32 %v964_v51, %v1886_v29  ;;  %v1593_v29 = vpack.i.bf16 %v2026_v26, %v2013_v9 }
 0x9b0   :  { %v988_v60 = vsel %vm354_vm2, %v965_v18, -inf }
 0x9b1   :  { %989 = vmax.xlane.f32.xlu1 %v988_v60 }
 0x9b5   :  { %v967_v62 = vpop.f32.mrf.mxu3 }
 0x9b6   :  { %v2082_v0 = vadd.f32 %v967_v62, %v1897_v38 }
 0x9b8   :  { %v991_v1 = vsel %vm354_vm2, %v2082_v0, -inf }
 0x9d2   :  { %986 = vmax.xlane.f32.xlu2 %v985_v63 }
 0x9d7   :  { %992 = vmax.xlane.f32.xlu0 %v991_v1 }
 0x9ea   :  { %1594 = vrot.lane.b32.xlu2 %v1593_v29, %s1754_s1 }
 0x9f4   :  { %v972_v2 = vpop.xlane.xlu0 %971 }
 0x9f5   :  { %v994_v33 = vsub.f32 %v947_v44, %v972_v2 }
 0x9f7   :  { %v1002_v3 = vmul.f32 1.442695, %v994_v33 }
 0x9f9   :  { %1657 = vpow2.f32 %v1002_v3 }
 0x9fc   :  { %v975_v4 = vpop.xlane.xlu1 %974 }
 0x9fd   :  { %v995_v7 = vsub.f32 %v950_v45, %v975_v4 }
 0x9ff   :  { %v2089_v5 = vpop.eup %1657  ;;  %v1004_v52 = vmul.f32 1.442695, %v995_v7 }
 0xa00   :  { %v1018_v38 = vsel %vm354_vm2, %v2089_v5, 0.0 }
 0xa01   :  { %1019 = vadd.xlane.f32.xlu1 %v1018_v38  ;;  %1659 = vpow2.f32 %v1004_v52 }
 0xa04   :  { %v978_v19 = vpop.xlane.xlu2 %977 }
 0xa05   :  { %v996_v42 = vsub.f32 %v2062_v50, %v978_v19 }
 0xa07   :  { %v2093_v11 = vpop.eup %1659  ;;  %v1006_v43 = vmul.f32 1.442695, %v996_v42 }
 0xa08   :  { %v1021_v13 = vsel %vm354_vm2, %v2093_v11, 0.0 }
 0xa0c   :  { %v981_v57 = vpop.xlane.xlu0 %980  ;;  %v1585_v30 = vpop.permute.xlu2 %1584 }
 0xa0d   :  { %v997_v8 = vsub.f32 %v956_v6, %v981_v57  ;;  %v1586_v32 = vunpack.i.l.bf16 %v1585_v30  ;;  %v1587_v21 = vunpack.i.h.bf16 %v1585_v30 }
 0xa0f   :  { %v1008_v9 = vmul.f32 1.442695, %v997_v8 }
 0xa11   :  { %1661 = vpow2.f32 %v1008_v9 }
 0xa13   :  { %1022 = vadd.xlane.f32.xlu2 %v1021_v13 }
 0xa14   :  { %v984_v15 = vpop.xlane.xlu1 %983 }
 0xa15   :  { %v998_v12 = vsub.f32 %v959_v10, %v984_v15 }
 0xa17   :  { %v2097_v17 = vpop.eup %1661  ;;  %v1010_v20 = vmul.f32 1.442695, %v998_v12 }
 0xa18   :  { %v1027_v23 = vsel %vm354_vm2, %v2097_v17, 0.0 }
 0xa19   :  { %1663 = vpow2.f32 %v1010_v20  ;;  %1028 = vadd.xlane.f32.xlu0 %v1027_v23 }
 0xa1a   :  { %1589 = vrot.lane.b32.xlu1 %v1588_v24, %s1754_s1 }
 0xa1f   :  { %v2104_v25 = vpop.eup %1663  ;;  %v1580_v26 = vpop.permute.xlu0 %1579 }
 0xa20   :  { %v1581_v27 = vunpack.i.l.bf16 %v1580_v26  ;;  %v1030_v16 = vsel %vm354_vm2, %v2104_v25, 0.0  ;;  %v1582_v31 = vunpack.i.h.bf16 %v1580_v26 }
 0xa21   :  { %1031 = vadd.xlane.f32.xlu0 %v1030_v16 }
 0xa22   :  { %1114 = vmatpush.msra.mxu1 %v1581_v27 }
 0xa24   :  { %v990_v34 = vpop.xlane.xlu1 %989  ;;  %1115 = vmatpush.msra.mxu1 %v1582_v31 }
 0xa25   :  { %v1000_v36 = vsub.f32 %v965_v18, %v990_v34 }
 0xa26   :  { %1116 = vmatpush.msra.mxu1 %v1586_v32 }
 0xa27   :  { %v1014_v28 = vmul.f32 1.442695, %v1000_v36  ;;  %v1607_v36 = vld [vmem:[#allocation4 + $0x2e8] ss:$0 sm:$0xff] }
 0xa28   :  { %1117 = vmatpush.msra.mxu1 %v1587_v21 }
 0xa29   :  { %1665 = vpow2.f32 %v1014_v28 }
 0xa2a   :  { %1667 = vpow2.f32 %v1006_v43 }
 0xa2f   :  { %v2108_v39 = vpop.eup %1665 }
 0xa30   :  { %v1036_v41 = vsel %vm354_vm2, %v2108_v39, 0.0  ;;  %v1668_v44 = vpop.eup %1667 }
 0xa31   :  { %1037 = vadd.xlane.f32.xlu2 %v1036_v41  ;;  %v1024_v40 = vsel %vm354_vm2, %v1668_v44, 0.0 }
 0xa44   :  { %1025 = vadd.xlane.f32.xlu1 %v1024_v40 }
 0xa45   :  { %v987_v35 = vpop.xlane.xlu2 %986 }
 0xa46   :  { %v999_v45 = vsub.f32 %v2077_v22, %v987_v35 }
 0xa48   :  { %v1012_v47 = vmul.f32 1.442695, %v999_v45 }
 0xa4a   :  { %1669 = vpow2.f32 %v1012_v47  ;;  %v993_v49 = vpop.xlane.xlu0 %992 }
 0xa4b   :  { %v1001_v53 = vsub.f32 %v2082_v0, %v993_v49 }
 0xa4d   :  { %v1016_v37 = vmul.f32 1.442695, %v1001_v53  ;;  %v1595_v48 = vpop.permute.xlu2 %1594 }
 0xa4e   :  { %v1596_v60 = vunpack.i.l.bf16 %v1595_v48  ;;  %v1597_v22 = vunpack.i.h.bf16 %v1595_v48 }
 0xa4f   :  { %1671 = vpow2.f32 %v1016_v37 }
 0xa50   :  { %v1670_v6 = vpop.eup %1669 }
 0xa51   :  { %v1033_v54 = vsel %vm354_vm2, %v1670_v6, 0.0 }
 0xa52   :  { %1034 = vadd.xlane.f32.xlu0 %v1033_v54 }
 0xa55   :  { %v1672_v50 = vpop.eup %1671 }
 0xa56   :  { %v1039_v55 = vsel %vm354_vm2, %v1672_v50, 0.0 }
 0xa57   :  { %1040 = vadd.xlane.f32.xlu1 %v1039_v55 }
 0xa74   :  { %v1020_v10 = vpop.xlane.xlu1 %1019 }
 0xa75   :  { %1673 = vrcp.f32 %v1020_v10 }
 0xa7b   :  { %v1674_v18 = vpop.eup %1673 }
 0xa7c   :  { %v1050_v62 = vmul.f32 %v1674_v18, %v2089_v5  ;;  %v1222_v18 = vld [vmem:[#allocation4 + $0x308] sm:$0xff] }
 0xa7d   :  { %1243 = vmatpush.msra.mxu0 %v1222_v18 }
 0xa86   :  { %v1023_v51 = vpop.xlane.xlu2 %1022 }
 0xa87   :  { %1675 = vrcp.f32 %v1023_v51 }
 0xa8c   :  { %v1590_v59 = vpop.permute.xlu1 %1589  ;;  %v1029_v29 = vpop.xlane.xlu0 %1028 }
 0xa8d   :  { %v1591_v14 = vunpack.i.l.bf16 %v1590_v59  ;;  %v1592_v56 = vunpack.i.h.bf16 %v1590_v59  ;;  %v1676_v63 = vpop.eup %1675 }
 0xa8e   :  { %v1051_v0 = vmul.f32 %v1676_v63, %v2093_v11 }
 0xa8f   :  { %1118 = vmatpush.msra.mxu1 %v1591_v14 }
 0xa91   :  { %1119 = vmatpush.msra.mxu1 %v1592_v56 }
 0xa93   :  { %1120 = vmatpush.msra.mxu1 %v1596_v60  ;;  %v1221_v60 = vld [vmem:[#allocation4 + $0x300] sm:$0xff] }
 0xa94   :  { %v1032_v3 = vpop.xlane.xlu0 %1031  ;;  %1244 = vmatpush.msra.mxu0 %v1221_v60 }
 0xa95   :  { %1121 = vmatpush.msra.mxu1 %v1597_v22  ;;  %v1220_v22 = vld [vmem:[#allocation4 + $0x2f8] sm:$0xff] }
 0xa96   :  { %1531 = vmatmul.msk.f32.vlgmr.msra.gmra.mxu1 %vm354_vm2, %v1050_v62  ;;  %1245 = vmatpush.msra.mxu0 %v1220_v22  ;;  %v1219_v62 = vld [vmem:[#allocation4 + $0x2f0] sm:$0xff] }
 0xa98   :  { %1246 = vmatpush.msra.mxu0 %v1219_v62 }
 0xa9e   :  { %1532 = vmatmul.msk.f32.gmra.mxu1 %vm354_vm2, %v1051_v0 }
 0xaa4   :  { %v1038_v57 = vpop.xlane.xlu2 %1037 }
 0xab7   :  { %v1026_v1 = vpop.xlane.xlu1 %1025 }
 0xab8   :  { %1677 = vrcp.f32 %v1026_v1 }
 0xab9   :  { %1679 = vrcp.f32 %v1029_v29  ;;  %v1271_v29 = vld [vmem:[#allocation4 + $0x390] sm:$0xff] }
 0xaba   :  { %1681 = vrcp.f32 %v1032_v3  ;;  %1274 = vmatpush.msrb.mxu2 %v1271_v29 }
 0xabe   :  { %v1678_v2 = vpop.eup %1677 }
 0xabf   :  { %v1052_v33 = vmul.f32 %v1678_v2, %v1668_v44  ;;  %v1680_v4 = vpop.eup %1679  ;;  %v1270_v2 = vld [vmem:[#allocation4 + $0x388] sm:$0xff] }
 0xac0   :  { %v1053_v5 = vmul.f32 %v1680_v4, %v2097_v17  ;;  %v1682_v7 = vpop.eup %1681  ;;  %1275 = vmatpush.msrb.mxu2 %v1270_v2 }
 0xac1   :  { %1533 = vmatmul.msk.f32.gmra.mxu1 %vm354_vm2, %v1052_v33  ;;  %v1054_v52 = vmul.f32 %v1682_v7, %v2104_v25  ;;  %v1269_v33 = vld [vmem:[#allocation4 + $0x380] sm:$0xff] }
 0xac2   :  { %1276 = vmatpush.msrb.mxu2 %v1269_v33 }
 0xac5   :  { %v1035_v38 = vpop.xlane.xlu0 %1034 }
 0xac6   :  { %1683 = vrcp.f32 %v1035_v38 }
 0xac7   :  { %1685 = vrcp.f32 %v1038_v57 }
 0xac9   :  { %1534 = vmatmul.msk.f32.gmra.mxu1 %vm354_vm2, %v1053_v5  ;;  %v1268_v5 = vld [vmem:[#allocation4 + $0x378] sm:$0xff] }
 0xaca   :  { %v1041_v9 = vpop.xlane.xlu1 %1040  ;;  %1277 = vmatpush.msrb.mxu2 %v1268_v5  ;;  %v1353_v5 = vld [vmem:[#allocation4 + $0x3d0] sm:$0xff] }
 0xacb   :  { %1687 = vrcp.f32 %v1041_v9  ;;  %v1265_v9 = vld [vmem:[#allocation4 + $0x360] sm:$0xff] }
 0xacc   :  { %v1684_v8 = vpop.eup %1683 }
 0xacd   :  { %v1055_v11 = vmul.f32 %v1684_v8, %v1670_v6  ;;  %v1686_v13 = vpop.eup %1685  ;;  %v1266_v8 = vld [vmem:[#allocation4 + $0x368] sm:$0xff] }
 0xace   :  { %v1056_v15 = vmul.f32 %v1686_v13, %v2108_v39 }
 0xad1   :  { %1535 = vmatmul.msk.f32.gmra.mxu1 %vm354_vm2, %v1054_v52  ;;  %v1688_v12 = vpop.eup %1687  ;;  %v1267_v52 = vld [vmem:[#allocation4 + $0x370] sm:$0xff] }
 0xad2   :  { %v1057_v17 = vmul.f32 %v1688_v12, %v1672_v50  ;;  %1278 = vmatpush.msrb.mxu2 %v1267_v52 }
 0xad4   :  { %1279 = vmatpush.msrb.mxu2 %v1266_v8 }
 0xad6   :  { %1280 = vmatpush.msrb.mxu2 %v1265_v9  ;;  %v1436_v9 = vld [vmem:[#allocation4 + $0x460] sm:$0xff] }
 0xad9   :  { %1536 = vmatmul.msk.f32.gmra.mxu1 %vm354_vm2, %v1055_v11 }
 0xae1   :  { %1537 = vmatmul.msk.f32.gmra.mxu1 %vm354_vm2, %v1056_v15  ;;  %v1264_v15 = vld [vmem:[#allocation4 + $0x358] sm:$0xff] }
 0xae2   :  { %1281 = vmatpush.msrb.mxu2 %v1264_v15  ;;  %v1435_v15 = vld [vmem:[#allocation4 + $0x458] sm:$0xff] }
 0xae9   :  { %1538 = vmatmul.msk.f32.gmra.mxu1 %vm354_vm2, %v1057_v17 }
 0xb13   :  { %v1123_v19 = vpop.f32.mrf.mxu1 }
 0xb14   :  { %v1147_v16 = vsel %vm51_vm0, %v1123_v19, 0.0  ;;  %v1263_v19 = vld [vmem:[#allocation4 + $0x350] sm:$0xff] }
 0xb15   :  { %1282 = vmatpush.msrb.mxu2 %v1263_v19 }
 0xb1b   :  { %v1126_v20 = vpop.f32.mrf.mxu1 }
 0xb1c   :  { %v1154_v42 = vsel %vm51_vm0, %v1126_v20, 0.0 }
 0xb3e   :  { %v1129_v23 = vpop.f32.mrf.mxu1 }
 0xb3f   :  { %v1148_v27 = vsel %vm51_vm0, %v1129_v23, 0.0 }
 0xb40   :  { %v1149_v31 = vadd.f32 %v1148_v27, %v1147_v16 }
 0xb46   :  { %v1132_v24 = vpop.f32.mrf.mxu1 }
 0xb47   :  { %v1155_v39 = vsel %vm51_vm0, %v1132_v24, 0.0  ;;  %v1608_v24 = vld [vmem:[#allocation4 + $0x3a0] ss:$0 sm:$0xff] }
 0xb48   :  { %v1156_v44 = vadd.f32 %v1155_v39, %v1154_v42  ;;  %v1259_v39 = vld [vmem:[#allocation4 + $0x330] sm:$0xff] }
 0xb4e   :  { %v1135_v25 = vpop.f32.mrf.mxu1 }
 0xb4f   :  { %v1150_v30 = vsel %vm51_vm0, %v1135_v25, 0.0  ;;  %v1262_v25 = vld [vmem:[#allocation4 + $0x348] sm:$0xff] }
 0xb50   :  { %v1151_v32 = vadd.f32 %v1150_v30, %v1149_v31  ;;  %v1609_v30 = vld [vmem:[#allocation4 + $0x3a8] ss:$0 sm:$0xff]  ;;  %v1261_v31 = vld [vmem:[#allocation4 + $0x340] sm:$0xff]  ;;  %1283 = vmatpush.msrb.mxu2 %v1262_v25 }
 0xb52   :  { %1284 = vmatpush.msrb.mxu2 %v1261_v31 }
 0xb56   :  { %v1138_v26 = vpop.f32.mrf.mxu1 }
 0xb57   :  { %v1157_v43 = vsel %vm51_vm0, %v1138_v26, 0.0 }
 0xb58   :  { %v1158_v35 = vadd.f32 %v1157_v43, %v1156_v44 }
 0xb5e   :  { %v1141_v34 = vpop.f32.mrf.mxu1 }
 0xb5f   :  { %v1152_v21 = vsel %vm51_vm0, %v1141_v34, 0.0 }
 0xb60   :  { %v1153_v28 = vadd.f32 %v1152_v21, %v1151_v32 }
 0xb62   :  { %v1163_v41 = vadd.f32 %v1607_v36, %v1153_v28 }
 0xb64   :  { %v1165_v40 = vadd.f32 %v1163_v41, %v1988_v58 }
 0xb66   :  { %v1144_v45 = vpop.f32.mrf.mxu1  ;;  %v1169_v47 = vsel %vm51_vm0, %v1165_v40, 0.0 }
 0xb67   :  { %v1159_v49 = vsel %vm51_vm0, %v1144_v45, 0.0  ;;  %1170 = vadd.xlane.f32.xlu0 %v1169_v47  ;;  %v1257_v45 = vld [vmem:[#allocation4 + $0x320] sm:$0xff]  ;;  %v1256_v47 = vld [vmem:[#allocation4 + $0x318] sm:$0xff] }
 0xb68   :  { %v1160_v53 = vadd.f32 %v1159_v49, %v1158_v35  ;;  %v1258_v35 = vld [vmem:[#allocation4 + $0x328] sm:$0xff]  ;;  %v1610_v49 = vld [vmem:[#allocation4 + $0x310] ss:$0 sm:$0xff] }
 0xb6a   :  { %v1164_v37 = vadd.f32 %v1607_v36, %v1160_v53  ;;  %v1260_v36 = vld [vmem:[#allocation4 + $0x338] sm:$0xff] }
 0xb6b   :  { %1285 = vmatpush.msrb.mxu2 %v1260_v36 }
 0xb6c   :  { %v1166_v6 = vadd.f32 %v1164_v37, %v1995_v61 }
 0xb6d   :  { %1286 = vmatpush.msrb.mxu2 %v1259_v39 }
 0xb6e   :  { %v1172_v54 = vsel %vm51_vm0, %v1166_v6, 0.0 }
 0xb6f   :  { %1173 = vadd.xlane.f32.xlu2 %v1172_v54  ;;  %1287 = vmatpush.msrb.mxu2 %v1258_v35 }
 0xb71   :  { %1288 = vmatpush.msrb.mxu2 %v1257_v45 }
 0xb73   :  { %1289 = vmatpush.msrb.mxu2 %v1256_v47 }
 0xbda   :  { %v1171_v50 = vpop.xlane.xlu0 %1170 }
 0xbdb   :  { %v1175_v55 = vmul.f32 %v1171_v50, %v1961_v46 }
 0xbdd   :  { %v1177_v10 = vsub.f32 %v1165_v40, %v1175_v55 }
 0xbdf   :  { %v1179_v48 = vmul.f32 %v1177_v10, %v1177_v10 }
 0xbe1   :  { %v1181_v58 = vsel %vm51_vm0, %v1179_v48, 0.0 }
 0xbe2   :  { %1182 = vadd.xlane.f32.xlu1 %v1181_v58  ;;  %v1174_v59 = vpop.xlane.xlu2 %1173 }
 0xbe3   :  { %v1176_v14 = vmul.f32 %v1174_v59, %v1961_v46 }
 0xbe5   :  { %v2146_v56 = vsub.f32 %v1166_v6, %v1176_v14 }
 0xbe7   :  { %v1180_v51 = vmul.f32 %v2146_v56, %v2146_v56 }
 0xbe9   :  { %v1184_v61 = vsel %vm51_vm0, %v1180_v51, 0.0 }
 0xbea   :  { %1185 = vadd.xlane.f32.xlu0 %v1184_v61 }
 0xc55   :  { %v1183_v63 = vpop.xlane.xlu1 %1182 }
 0xc56   :  { %v1187_v0 = vmul.f32 %v1183_v63, %v1961_v46 }
 0xc58   :  { %v1189_v1 = vadd.f32 1e-05, %v1187_v0 }
 0xc5a   :  { %1689 = vrsqrt.f32 %v1189_v1  ;;  %vm1197_vm3 = vweird.f32 %v1189_v1 }
 0xc5d   :  { %v1186_v3 = vpop.xlane.xlu0 %1185 }
 0xc5e   :  { %v1188_v4 = vmul.f32 %v1186_v3, %v1961_v46 }
 0xc60   :  { %v1690_v38 = vpop.eup %1689  ;;  %v1190_v7 = vadd.f32 1e-05, %v1188_v4  ;;  %v1354_v4 = vld [vmem:[#allocation4 + $0x3d8] sm:$0xff] }
 0xc61   :  { %v1192_v57 = vmul.f32 %v1690_v38, %v1189_v1  ;;  %vm1198_vm1 = vweird.f32 %v1690_v38  ;;  %1375 = vmatpush.msrb.mxu0 %v1354_v4 }
 0xc62   :  { %1691 = vrsqrt.f32 %v1190_v7  ;;  %vm1199_vm4 = vmor %vm1197_vm3, %vm1198_vm1  ;;  %vm1207_vm6 = vweird.f32 %v1190_v7 }
 0xc63   :  { %v1193_v11 = vmul.f32 %v1690_v38, %v1192_v57  ;;  %1376 = vmatpush.msrb.mxu0 %v1353_v5 }
 0xc65   :  { %v1194_v13 = vmul.f32 0.5, %v1193_v11  ;;  %v1396_v11 = vld [vmem:[#allocation4 + $0x420] sm:$0xff] }
 0xc66   :  { %1412 = vmatpush.msra.mxu2 %v1396_v11 }
 0xc67   :  { %v1195_v12 = vsub.f32 1.5, %v1194_v13  ;;  %v1395_v13 = vld [vmem:[#allocation4 + $0x418] sm:$0xff] }
 0xc68   :  { %v1692_v17 = vpop.eup %1691  ;;  %1413 = vmatpush.msra.mxu2 %v1395_v13 }
 0xc69   :  { %v1196_v20 = vmul.f32 %v1690_v38, %v1195_v12  ;;  %v1202_v23 = vmul.f32 %v1692_v17, %v1190_v7  ;;  %vm1208_vm5 = vweird.f32 %v1692_v17  ;;  %v1351_v7 = vld [vmem:[#allocation4 + $0x3c0] sm:$0xff]  ;;  %v1394_v12 = vld [vmem:[#allocation4 + $0x410] sm:$0xff] }
 0xc6a   :  { %vm1209_vm7 = vmor %vm1207_vm6, %vm1208_vm5  ;;  %1414 = vmatpush.msra.mxu2 %v1394_v12 }
 0xc6b   :  { %v1200_v26 = vsel %vm1199_vm4, %v1690_v38, %v1196_v20  ;;  %v1203_v27 = vmul.f32 %v1692_v17, %v1202_v23  ;;  %v1352_v38 = vld [vmem:[#allocation4 + $0x3c8] sm:$0xff] }
 0xc6c   :  { %v1211_v16 = vmul.f32 %v1200_v26, %v1177_v10  ;;  %v1611_v10 = vld [vmem:[#allocation4 + $0x398] ss:$0 sm:$0xff]  ;;  %1377 = vmatpush.msrb.mxu0 %v1352_v38  ;;  %v1393_v23 = vld [vmem:[#allocation4 + $0x408] sm:$0xff] }
 0xc6d   :  { %v1204_v32 = vmul.f32 0.5, %v1203_v27  ;;  %v1392_v27 = vld [vmem:[#allocation4 + $0x400] sm:$0xff]  ;;  %1415 = vmatpush.msra.mxu2 %v1393_v23 }
 0xc6e   :  { %v1214_v34 = vmul.f32 %v1608_v24, %v1211_v16  ;;  %1378 = vmatpush.msrb.mxu0 %v1351_v7  ;;  %v1432_v16 = vld [vmem:[#allocation4 + $0x440] sm:$0xff] }
 0xc6f   :  { %v1205_v21 = vsub.f32 1.5, %v1204_v32  ;;  %1416 = vmatpush.msra.mxu2 %v1392_v27 }
 0xc70   :  { %v1217_v28 = vadd.f32 %v1609_v30, %v1214_v34 }
 0xc71   :  { %v1206_v41 = vmul.f32 %v1692_v17, %v1205_v21 }
 0xc72   :  { %1539 = vmatmul.msk.f32.vlgmr.msra.gmra.mxu0 %vm51_vm0, %v1217_v28 }
 0xc73   :  { %v1210_v42 = vsel %vm1209_vm7, %v1692_v17, %v1206_v41  ;;  %1446 = vmatpush.msra.mxu0 %v1436_v9  ;;  %v1434_v17 = vld [vmem:[#allocation4 + $0x450] sm:$0xff] }
 0xc74   :  { %v1212_v43 = vmul.f32 %v1210_v42, %v2146_v56 }
 0xc75   :  { %1447 = vmatpush.msra.mxu0 %v1435_v15 }
 0xc76   :  { %v1215_v44 = vmul.f32 %v1608_v24, %v1212_v43  ;;  %v1433_v24 = vld [vmem:[#allocation4 + $0x448] sm:$0xff]  ;;  %v1613_v43 = vld [vmem:[#allocation4 + $0x3b8] ss:$0 sm:$0xff] }
 0xc77   :  { %1448 = vmatpush.msra.mxu0 %v1434_v17 }
 0xc78   :  { %v1218_v40 = vadd.f32 %v1609_v30, %v1215_v44 }
 0xc79   :  { %1449 = vmatpush.msra.mxu0 %v1433_v24 }
 0xc7a   :  { %1540 = vmatmul.msk.f32.gmra.mxu0 %vm51_vm0, %v1218_v40 }
 0xc7b   :  { %1450 = vmatpush.msra.mxu0 %v1432_v16 }
 0xcef   :  { %v1248_v53 = vpop.f32.mrf.mxu0 }
 0xcf0   :  { %v1249_v37 = vadd.f32 %v1610_v49, %v1248_v53 }
 0xcf2   :  { %v1254_v6 = vmax.f32 %v1249_v37, 0.0 }
 0xcf4   :  { %1290 = vmatmul.f32.vlgmr.msrb.gmra.mxu2 %v1254_v6 }
 0xcf7   :  { %v1251_v54 = vpop.f32.mrf.mxu0 }
 0xcf8   :  { %v1252_v50 = vadd.f32 %v1610_v49, %v1251_v54  ;;  %v1391_v54 = vld [vmem:[#allocation4 + $0x3f8] sm:$0xff] }
 0xcf9   :  { %1417 = vmatpush.msra.mxu2 %v1391_v54 }
 0xcfa   :  { %v1255_v55 = vmax.f32 %v1252_v50, 0.0  ;;  %v1431_v50 = vld [vmem:[#allocation4 + $0x438] sm:$0xff] }
 0xcfb   :  { %1451 = vmatpush.msra.mxu0 %v1431_v50 }
 0xcfc   :  { %1293 = vmatmul.f32.gmra.mxu2 %v1255_v55  ;;  %v1390_v55 = vld [vmem:[#allocation4 + $0x3f0] sm:$0xff] }
 0xcfd   :  { %1418 = vmatpush.msra.mxu2 %v1390_v55 }
 0xd77   :  { %v1291_v48 = vpop.f32.mrf.mxu2 }
 0xd78   :  { %v1292_v58 = vadd.f32 %v1611_v10, %v1291_v48  ;;  %v1389_v48 = vld [vmem:[#allocation4 + $0x3e8] sm:$0xff] }
 0xd79   :  { %1419 = vmatpush.msra.mxu2 %v1389_v48 }
 0xd7a   :  { %v1297_v59 = vadd.f32 %v1292_v58, %v1217_v28  ;;  %v1612_v28 = vld [vmem:[#allocation4 + $0x3b0] ss:$0 sm:$0xff]  ;;  %v1429_v58 = vld [vmem:[#allocation4 + $0x428] sm:$0xff] }
 0xd7c   :  { %v1301_v14 = vsel %vm51_vm0, %v1297_v59, 0.0 }
 0xd7d   :  { %1302 = vadd.xlane.f32.xlu2 %v1301_v14 }
 0xd7f   :  { %v1294_v56 = vpop.f32.mrf.mxu2 }
 0xd80   :  { %v1295_v51 = vadd.f32 %v1611_v10, %v1294_v56  ;;  %v1430_v10 = vld [vmem:[#allocation4 + $0x430] sm:$0xff] }
 0xd81   :  { %1452 = vmatpush.msra.mxu0 %v1430_v10 }
 0xd82   :  { %v1298_v61 = vadd.f32 %v1295_v51, %v1218_v40 }
 0xd83   :  { %1453 = vmatpush.msra.mxu0 %v1429_v58 }
 0xd84   :  { %v1304_v18 = vsel %vm51_vm0, %v1298_v61, 0.0 }
 0xd85   :  { %1305 = vadd.xlane.f32.xlu1 %v1304_v18 }
 0xdf0   :  { %v1303_v60 = vpop.xlane.xlu2 %1302 }
 0xdf1   :  { %v1307_v22 = vmul.f32 %v1303_v60, %v1961_v46 }
 0xdf3   :  { %v1309_v62 = vsub.f32 %v1297_v59, %v1307_v22  ;;  %v1614_v59 = vld [vmem:[#allocation4 + $0x3e0] ss:$0 sm:$0xff]  ;;  %v1388_v22 = vld [vmem:[#allocation4 + $0x468] sm:$0x3] }
 0xdf5   :  { %v1311_v63 = vmul.f32 %v1309_v62, %v1309_v62 }
 0xdf7   :  { %v1313_v0 = vsel %vm51_vm0, %v1311_v63, 0.0 }
 0xdf8   :  { %v1306_v1 = vpop.xlane.xlu1 %1305  ;;  %1314 = vadd.xlane.f32.xlu0 %v1313_v0 }
 0xdf9   :  { %v1308_v29 = vmul.f32 %v1306_v1, %v1961_v46  ;;  %v1397_v1 = vperm.slane %v1388_v22, 0 }
 0xdfb   :  { %v2161_v2 = vsub.f32 %v1298_v61, %v1308_v29 }
 0xdfd   :  { %v1312_v33 = vmul.f32 %v2161_v2, %v2161_v2 }
 0xdff   :  { %v1316_v3 = vsel %vm51_vm0, %v1312_v33, 0.0 }
 0xe00   :  { %1317 = vadd.xlane.f32.xlu2 %v1316_v3 }
 0xe6b   :  { %v1315_v52 = vpop.xlane.xlu0 %1314 }
 0xe6c   :  { %v1319_v57 = vmul.f32 %v1315_v52, %v1961_v46 }
 0xe6e   :  { %v1321_v8 = vadd.f32 1e-05, %v1319_v57 }
 0xe70   :  { %1693 = vrsqrt.f32 %v1321_v8  ;;  %vm1329_vm9 = vweird.f32 %v1321_v8 }
 0xe73   :  { %v1318_v19 = vpop.xlane.xlu2 %1317 }
 0xe74   :  { %v1320_v20 = vmul.f32 %v1318_v19, %v1961_v46 }
 0xe76   :  { %v1694_v25 = vpop.eup %1693  ;;  %v1322_v26 = vadd.f32 1e-05, %v1320_v20 }
 0xe77   :  { %v1324_v30 = vmul.f32 %v1694_v25, %v1321_v8  ;;  %vm1330_vm8 = vweird.f32 %v1694_v25 }
 0xe78   :  { %1695 = vrsqrt.f32 %v1322_v26  ;;  %vm1331_vm10 = vmor %vm1329_vm9, %vm1330_vm8  ;;  %vm1339_vm12 = vweird.f32 %v1322_v26 }
 0xe79   :  { %v1325_v31 = vmul.f32 %v1694_v25, %v1324_v30 }
 0xe7b   :  { %v1326_v32 = vmul.f32 0.5, %v1325_v31 }
 0xe7d   :  { %v1327_v34 = vsub.f32 1.5, %v1326_v32 }
 0xe7e   :  { %v1696_v36 = vpop.eup %1695 }
 0xe7f   :  { %v1328_v46 = vmul.f32 %v1694_v25, %v1327_v34  ;;  %v1334_v21 = vmul.f32 %v1696_v36, %v1322_v26  ;;  %vm1340_vm11 = vweird.f32 %v1696_v36 }
 0xe80   :  { %vm1341_vm13 = vmor %vm1339_vm12, %vm1340_vm11 }
 0xe81   :  { %v1332_v39 = vsel %vm1331_vm10, %v1694_v25, %v1328_v46  ;;  %v1335_v41 = vmul.f32 %v1696_v36, %v1334_v21 }
 0xe82   :  { %v1343_v42 = vmul.f32 %v1332_v39, %v1309_v62  ;;  %v1437_v62 = vperm.slane %v1388_v22, 1 }
 0xe83   :  { %v1336_v44 = vmul.f32 0.5, %v1335_v41 }
 0xe84   :  { %v1346_v40 = vmul.f32 %v1612_v28, %v1343_v42 }
 0xe85   :  { %v1337_v35 = vsub.f32 1.5, %v1336_v44 }
 0xe86   :  { %v1349_v45 = vadd.f32 %v1613_v43, %v1346_v40 }
 0xe87   :  { %v1338_v47 = vmul.f32 %v1696_v36, %v1337_v35 }
 0xe88   :  { %1541 = vmatmul.msk.f32.vlgmr.msrb.gmra.mxu0 %vm51_vm0, %v1349_v45 }
 0xe89   :  { %v1342_v49 = vsel %vm1341_vm13, %v1696_v36, %v1338_v47 }
 0xe8a   :  { %v1344_v53 = vmul.f32 %v1342_v49, %v2161_v2 }
 0xe8c   :  { %v1347_v37 = vmul.f32 %v1612_v28, %v1344_v53 }
 0xe8e   :  { %v1350_v6 = vadd.f32 %v1613_v43, %v1347_v37 }
 0xe90   :  { %1542 = vmatmul.msk.f32.gmra.mxu0 %vm51_vm0, %v1350_v6 }
 0xf05   :  { %v1380_v14 = vpop.f32.mrf.mxu0 }
 0xf06   :  { %v1381_v56 = vadd.f32 %v1614_v59, %v1380_v14 }
 0xf08   :  { %v1386_v51 = vmax.f32 %v1381_v56, 0.0 }
 0xf0a   :  { %1543 = vmatmul.msk.f32.vlgmr.msra.gmra.mxu2 %vm354_vm2, %v1386_v51  ;;  %1545 = vmatmul.msk.f32.vlgmr.msra.gmra.mxu0 %vm354_vm2, %v1386_v51 }
 0xf0d   :  { %v1383_v61 = vpop.f32.mrf.mxu0 }
 0xf0e   :  { %v1384_v18 = vadd.f32 %v1614_v59, %v1383_v61 }
 0xf10   :  { %v1387_v60 = vmax.f32 %v1384_v18, 0.0 }
 0xf12   :  { %1544 = vmatmul.msk.f32.gmra.mxu2 %vm354_vm2, %v1387_v60  ;;  %1546 = vmatmul.msk.f32.gmra.mxu0 %vm354_vm2, %v1387_v60 }
 0xf87   :  { %v1455_v63 = vpop.f32.mrf.mxu0 }
 0xf88   :  { %v1456_v0 = vadd.f32 %v1455_v63, %v1437_v62 }
 0xf8a   :  { %1461 = vst [vmem:[%s2189_s2 + $0x8] sm:$0xff] %v1456_v0 }
 0xf8d   :  { %v1421_v29 = vpop.f32.mrf.mxu2 }
 0xf8e   :  { %v1422_v2 = vadd.f32 %v1421_v29, %v1397_v1 }
 0xf8f   :  { %v1458_v33 = vpop.f32.mrf.mxu0 }
 0xf90   :  { %1427 = vst [vmem:[%s2189_s2] sm:$0xff] %v1422_v2  ;;  %v1459_v3 = vadd.f32 %v1458_v33, %v1437_v62 }
 0xf92   :  { %1462 = vst [vmem:[%s2189_s2 + $0x18] sm:$0xff] %v1459_v3 }
 0xf95   :  { %v1424_v4 = vpop.f32.mrf.mxu2 }
 0xf96   :  { %v1425_v5 = vadd.f32 %v1424_v4, %v1397_v1 }
 0xf98   :  { %1428 = vst [vmem:[%s2189_s2 + $0x10] sm:$0xff] %v1425_v5 }
 0xf99   :  { %1467 = vsyncpa [#allocation3], 1 }
 0xf9a   :  { %1468 = vsyncpa [#allocation5], 1 }

</bundles_post_ra>
